<compile_context>
chip_gen: v6e
topology: v6e:2x2x1
jax: 0.10.0
libtpu: 0.0.40
codegen_flags: <defaults>
</compile_context>

<pallas_src>
import math
import jax
import jax.numpy as jnp
from jax import lax
from jax.experimental import pallas as pl
from jax.experimental.pallas import tpu as pltpu

# ----- small config (consistent with ZLmConfig constraints) -----
VOCAB = 100
HIDDEN = 32
MLP = 64
HEAD = 16
NHEADS = 4
QKV = HEAD * NHEADS            # 64
NREG = 2
NLAYERS = 2
Z_SIZE = 16
ZL = Z_SIZE // NLAYERS         # 8  (z_size % num_layers == 0)
NORM_EPS = 1e-5
ROPE_FRACTION = 2
ROPE_BASE = 10000.0
BS = 2
SEQ = 8
R = BS * SEQ                   # 16 rows processed together (batch folded in)

ROPE_DIM = HEAD // ROPE_FRACTION   # 8
HALF = ROPE_DIM // 2               # 4
UP_SIZE = 3 * QKV + 2 * MLP        # 320 logical fused-up width
BLK = 128                          # lane-aligned segment stride
UP_SEG_SIZES = (QKV, QKV, QKV, MLP, MLP)
UP_PAD = BLK * len(UP_SEG_SIZES)   # 640: q|k|v|gate|val, each in its own 128 lanes
XCOLS = UP_PAD + BLK               # 768: padded up_x | z_proj block   (128-aligned)
ZCOLS = UP_PAD + BLK               # 768: padded up_z | alpha*down_z   (128-aligned)
OUT_PAD = 128                      # lane-dense output slab width
MASK_VAL = -1e30

Z_SCALE = math.sqrt(1.0 / Z_SIZE)
SOFTPLUS_SHIFT = math.log(math.e - 1.0)
INV_SQRT2 = 1.0 / math.sqrt(2.0)
ATTN_SCALE = 1.0 / math.sqrt(HEAD)


# ---------------------------------------------------------------------------
# The single fused kernel: embed/noise combine + NLAYERS encoder layers.
# ---------------------------------------------------------------------------
def zlm_encoder_kernel(hx_ref, nz_ref, wnp_ref, rope_ref, mask_ref,
                       wx_ref, wz_ref, wd_ref, reg_ref, out_ref):
    f32 = jnp.float32

    he = hx_ref[...]                      # (R, HIDDEN) token embeddings
    nz = nz_ref[...]                      # (R, 2*Z_SIZE): [shifted noise | flat noise]
    cos_t = rope_ref[0]                   # (R, BLK) RoPE tables over a q-or-k block
    sinp_t = rope_ref[1]
    sinm_t = rope_ref[2]
    mask = mask_ref[...]                  # (R, R+NREG) additive mask (batch + anti-causal)

    # --- embedding + shifted-noise projection combine ---
    # h[:, :-1] = (h[:, :-1] + noise_proj(noise_flat[:, 1:])) / sqrt(2)
    # shifted noise is zero-padded at the last position, so proj is already 0
    # there; only the /sqrt(2) scaling is position-dependent.
    proj = jnp.dot(nz[:, :Z_SIZE], wnp_ref[...], preferred_element_type=f32)
    ridx = lax.broadcasted_iota(jnp.int32, (R, HIDDEN), 0)
    rowscale = jnp.where((ridx % SEQ) < (SEQ - 1), INV_SQRT2, 1.0)
    h = (he + proj) * rowscale

    def rope_rot(blk):
        # standard rotate_half RoPE over rope_dim lanes of each head; sin
        # tables are sign-folded and zeroed outside the rope lanes so the
        # two XLU rolls + VPU fma are exact.
        return (blk * cos_t
                + pltpu.roll(blk, HALF, 1) * sinp_t
                + pltpu.roll(blk, BLK - HALF, 1) * sinm_t)

    z_parts, mu_parts, sg_parts = [], [], []
    for l in range(NLAYERS):
        wx = wx_ref[l]                    # (HIDDEN, XCOLS)
        wz = wz_ref[l]                    # (ZL, ZCOLS)
        wd = wd_ref[l]                    # (QKV + MLP, HIDDEN), pre-scaled by alpha
        reg = reg_ref[l]                  # (2*NREG, QKV): K registers | V registers
        nl = nz[:, Z_SIZE + l * ZL: Z_SIZE + (l + 1) * ZL]   # (R, ZL) layer noise

        # --- ReZeroIO.enter: LayerNorm (no affine) ---
        mean = jnp.mean(h, axis=-1, keepdims=True)
        var = jnp.mean(jnp.square(h - mean), axis=-1, keepdims=True)
        x = (h - mean) * lax.rsqrt(var + NORM_EPS)

        # --- x @ [padded fused-up (x part) | z_scale * z_proj] in one matmul ---
        xo = jnp.dot(x, wx, preferred_element_type=f32)            # (R, XCOLS)
        mu = xo[:, UP_PAD:UP_PAD + ZL]
        t = xo[:, UP_PAD + ZL:UP_PAD + 2 * ZL] + SOFTPLUS_SHIFT
        # numerically stable softplus
        sigma = jnp.maximum(t, 0.0) + jnp.log1p(jnp.exp(-jnp.abs(t)))
        z = mu + sigma * nl

        # --- z @ [padded fused-up (z part) | alpha * down_z] in one matmul ---
        zo = jnp.dot(z, wz, preferred_element_type=f32)            # (R, ZCOLS)
        up = xo[:, :UP_PAD] + zo[:, :UP_PAD]                       # (R, 640)

        # --- RoPE on q and k blocks (1/sqrt(head) already folded into q cols) ---
        qb = rope_rot(up[:, 0:BLK])
        kb = rope_rot(up[:, BLK:2 * BLK])
        q = qb[:, :QKV]
        k = kb[:, :QKV]
        v = up[:, 2 * BLK:2 * BLK + QKV]
        gate = up[:, 3 * BLK:3 * BLK + MLP]
        val = up[:, 4 * BLK:4 * BLK + MLP]

        # --- attention: both sequences folded into one score matrix, masked
        #     for cross-batch / anti-causal pairs; registers appended as extra
        #     always-attendable keys/values (2 matmuls per head) ---
        heads = []
        for hh in range(NHEADS):
            sl = slice(hh * HEAD, (hh + 1) * HEAD)
            k_aug = jnp.concatenate([k[:, sl], reg[:NREG, sl]], axis=0)    # (R+NREG, HEAD)
            v_aug = jnp.concatenate([v[:, sl], reg[NREG:, sl]], axis=0)
            s = lax.dot_general(q[:, sl], k_aug, (((1,), (1,)), ((), ())),
                                preferred_element_type=f32) + mask
            m = jnp.max(s, axis=-1, keepdims=True)
            e = jnp.exp(s - m)
            den = jnp.sum(e, axis=-1, keepdims=True)
            heads.append(jnp.dot(e, v_aug, preferred_element_type=f32)
                         * pl.reciprocal(den, approx=True))
        attn = jnp.concatenate(heads, axis=-1)                              # (R, QKV)

        # --- GLU MLP: silu(gate) * val (EUP exp + approx reciprocal) ---
        mlp_out = gate * pl.reciprocal(1.0 + jnp.exp(-gate), approx=True) * val

        # --- fused down projection (alpha folded into wd / wz) + ReZero exit ---
        y = jnp.dot(jnp.concatenate([attn, mlp_out], axis=-1), wd,
                    preferred_element_type=f32) + zo[:, UP_PAD:UP_PAD + HIDDEN]
        h = h + y

        z_parts.append(z)
        mu_parts.append(mu)
        sg_parts.append(sigma)

    # --- single lane-dense output slab: [z_0|z_1|mu_0|mu_1|sg_0|sg_1|zeros] ---
    pad = jnp.zeros((R, OUT_PAD - 3 * NLAYERS * ZL), f32)
    out_ref[...] = jnp.concatenate(z_parts + mu_parts + sg_parts + [pad], axis=-1)


# ---------------------------------------------------------------------------
# Host-side constant / weight packing
# ---------------------------------------------------------------------------
def _pad_up_weight(w):
    """Scatter logical fused-up columns (q|k|v|gate|val) into 128-lane blocks."""
    out = jnp.zeros((w.shape[0], UP_PAD), jnp.float32)
    off = 0
    for i, sz in enumerate(UP_SEG_SIZES):
        out = out.at[:, i * BLK:i * BLK + sz].set(w[:, off:off + sz])
        off += sz
    return out


def _pad_lanes(w, width):
    return jnp.concatenate(
        [w, jnp.zeros((w.shape[0], width - w.shape[1]), jnp.float32)], axis=1)


def pack_params(params):
    # fold attention scale into q columns (RoPE is linear, so it commutes)
    q_scale = jnp.concatenate(
        [jnp.full((QKV,), ATTN_SCALE, jnp.float32),
         jnp.ones((UP_SIZE - QKV,), jnp.float32)])[None, :]
    wxs, wzs, wds, regs = [], [], [], []
    for lp in params["layers"]:
        alpha = lp["alpha"]
        wx = jnp.concatenate([_pad_up_weight(lp["wux"] * q_scale),
                              _pad_lanes(Z_SCALE * lp["wz"], BLK)], axis=1)   # (H, 768)
        wz = jnp.concatenate([_pad_up_weight(lp["wuz"] * q_scale),
                              _pad_lanes(alpha * lp["wdz"], BLK)], axis=1)    # (ZL, 768)
        wd = alpha * jnp.concatenate([lp["wda"], lp["wdm"]], axis=0)          # (128, 32)
        kreg = jnp.transpose(lp["kreg"], (1, 0, 2)).reshape(NREG, QKV)
        vreg = jnp.transpose(lp["vreg"], (1, 0, 2)).reshape(NREG, QKV)
        regs.append(jnp.concatenate([kreg, vreg], axis=0))                    # (4, 64)
        wxs.append(wx)
        wzs.append(wz)
        wds.append(wd)
    return jnp.stack(wxs), jnp.stack(wzs), jnp.stack(wds), jnp.stack(regs)


def build_rope_and_mask():
    pos = jnp.arange(SEQ, dtype=jnp.float32)[:, None]
    inv_freq = ROPE_BASE ** (-jnp.arange(HALF, dtype=jnp.float32) / HALF)
    ang = pos * inv_freq[None, :]                                            # (SEQ, HALF)
    cos_h = jnp.concatenate([jnp.cos(ang), jnp.cos(ang),
                             jnp.ones((SEQ, HEAD - ROPE_DIM), jnp.float32)], axis=-1)
    sin_h = jnp.concatenate([jnp.sin(ang), jnp.sin(ang),
                             jnp.zeros((SEQ, HEAD - ROPE_DIM), jnp.float32)], axis=-1)
    lane = jnp.arange(HEAD)
    # sinp pairs with roll(+HALF): active on head lanes [HALF, ROPE_DIM)
    sinp_h = jnp.where((lane >= HALF) & (lane < ROPE_DIM), sin_h, 0.0)
    # sinm pairs with roll(-HALF): active (negated) on head lanes [0, HALF)
    sinm_h = jnp.where(lane < HALF, -sin_h, 0.0)

    def expand(tab, padval):
        tab = jnp.tile(tab, (1, NHEADS))                                     # (SEQ, QKV)
        tab = jnp.concatenate(
            [tab, jnp.full((SEQ, BLK - QKV), padval, jnp.float32)], axis=-1)  # (SEQ, 128)
        return jnp.tile(tab, (BS, 1))                                        # (R, 128)

    rope = jnp.stack([expand(cos_h, 1.0), expand(sinp_h, 0.0), expand(sinm_h, 0.0)])

    # additive attention mask over folded batch rows + register columns.
    # torch.tril(full(-inf), diagonal=-1): key position < query position is
    # masked; cross-batch pairs are masked because both sequences share one
    # score matrix.
    ridx = jnp.arange(R)
    bidx = ridx // SEQ
    pidx = ridx % SEQ
    blocked = (bidx[:, None] != bidx[None, :]) | (pidx[None, :] < pidx[:, None])
    m = jnp.where(blocked, MASK_VAL, 0.0).astype(jnp.float32)
    m = jnp.concatenate([m, jnp.zeros((R, NREG), jnp.float32)], axis=-1)     # (R, R+NREG)
    return rope, m


# ---------------------------------------------------------------------------
# Params + forward
# ---------------------------------------------------------------------------
def init_params(key):
    ks = iter(jax.random.split(key, 64))

    def w(shape, scale=0.02):
        return (scale * jax.random.normal(next(ks), shape)).astype(jnp.float32)

    params = {
        "embs": w((VOCAB, HIDDEN), 1.0),
        "wnp": w((Z_SIZE, HIDDEN)),
        "layers": [],
    }
    for _ in range(NLAYERS):
        params["layers"].append({
            "wz": w((HIDDEN, 2 * ZL)),
            "wux": w((HIDDEN, UP_SIZE)),
            "wuz": w((ZL, UP_SIZE)),
            "wdz": w((ZL, HIDDEN)),
            "wda": w((QKV, HIDDEN)),
            "wdm": w((MLP, HIDDEN)),
            "kreg": w((NHEADS, NREG, HEAD), 1.0),
            "vreg": w((NHEADS, NREG, HEAD), 1.0),
            # ReZero initializes alpha=0; use a nonzero value so the residual
            # path is actually exercised in this synthetic test.
            "alpha": jnp.asarray(0.1, jnp.float32),
        })
    return params


def zlm_encoder_forward(params, input_ids, noise):
    bs, seq = input_ids.shape
    # embedding gather stays in XLA glue (data-dependent gather)
    hx = jnp.take(params["embs"], input_ids, axis=0).reshape(bs * seq, HIDDEN)
    nflat = noise.reshape(bs, seq, Z_SIZE).astype(jnp.float32)
    nshift = jnp.concatenate(
        [nflat[:, 1:], jnp.zeros((bs, 1, Z_SIZE), jnp.float32)], axis=1)
    nz = jnp.concatenate([nshift, nflat], axis=-1).reshape(bs * seq, 2 * Z_SIZE)

    rope, mask = build_rope_and_mask()
    wx, wz, wd, reg = pack_params(params)

    slab = pl.pallas_call(
        zlm_encoder_kernel,
        out_shape=jax.ShapeDtypeStruct((bs * seq, OUT_PAD), jnp.float32),
    )(hx, nz, params["wnp"], rope, mask, wx, wz, wd, reg)

    nzl = NLAYERS * ZL
    zs = slab[:, 0:nzl].reshape(bs, seq, NLAYERS, ZL)
    mus = slab[:, nzl:2 * nzl].reshape(bs, seq, NLAYERS, ZL)
    sigmas = slab[:, 2 * nzl:3 * nzl].reshape(bs, seq, NLAYERS, ZL)
    return zs, mus, sigmas


if __name__ == "__main__":
    key = jax.random.PRNGKey(0)
    kparams, kid, knoise = jax.random.split(key, 3)
    params = init_params(kparams)
    input_ids = jax.random.randint(kid, (BS, SEQ), 0, VOCAB)
    noise = jax.random.normal(knoise, (BS, SEQ, NLAYERS, ZL), dtype=jnp.float32)

    fwd = jax.jit(zlm_encoder_forward)
    zs, mus, sigmas = fwd(params, input_ids, noise)
    jax.block_until_ready((zs, mus, sigmas))

    assert zs.shape == (BS, SEQ, NLAYERS, ZL)
    assert mus.shape == (BS, SEQ, NLAYERS, ZL)
    assert sigmas.shape == (BS, SEQ, NLAYERS, ZL)
    assert bool(jnp.all(jnp.isfinite(zs)))
    assert bool(jnp.all(jnp.isfinite(mus)))
    assert bool(jnp.all(jnp.isfinite(sigmas)))
    assert bool(jnp.all(sigmas > 0.0))
    print("KERNEL_OK")
</pallas_src>

<mosaic_0001>
module attributes {stable_mosaic.version = 11 : i64} {
  func.func @zlm_encoder_kernel(%arg0: memref<16x32xf32, #tpu.memory_space<vmem>>, %arg1: memref<16x32xf32, #tpu.memory_space<vmem>>, %arg2: memref<16x32xf32, #tpu.memory_space<vmem>>, %arg3: memref<3x16x128xf32, #tpu.memory_space<vmem>>, %arg4: memref<16x18xf32, #tpu.memory_space<vmem>>, %arg5: memref<2x32x768xf32, #tpu.memory_space<vmem>>, %arg6: memref<2x8x768xf32, #tpu.memory_space<vmem>>, %arg7: memref<2x128x32xf32, #tpu.memory_space<vmem>>, %arg8: memref<2x4x64xf32, #tpu.memory_space<vmem>>, %arg9: memref<16x128xf32, #tpu.memory_space<vmem>>) attributes {dimension_semantics = [], scalar_prefetch = 0 : i64, scratch_operands = 0 : i64, tpu.core_type = #tpu.core_type<tc>} {
    %c0 = arith.constant 0 : index
    %c0_0 = arith.constant 0 : index
    %0 = vector.load %arg0[%c0, %c0_0] : memref<16x32xf32, #tpu.memory_space<vmem>>, vector<16x32xf32>
    %c0_1 = arith.constant 0 : index
    %c0_2 = arith.constant 0 : index
    %1 = vector.load %arg1[%c0_1, %c0_2] : memref<16x32xf32, #tpu.memory_space<vmem>>, vector<16x32xf32>
    %c0_3 = arith.constant 0 : index
    %c0_4 = arith.constant 0 : index
    %c0_5 = arith.constant 0 : index
    %2 = vector.load %arg3[%c0_3, %c0_4, %c0_5] : memref<3x16x128xf32, #tpu.memory_space<vmem>>, vector<1x16x128xf32>
    %3 = vector.shape_cast %2 : vector<1x16x128xf32> to vector<16x128xf32>
    %c1 = arith.constant 1 : index
    %c0_6 = arith.constant 0 : index
    %c0_7 = arith.constant 0 : index
    %4 = vector.load %arg3[%c1, %c0_6, %c0_7] : memref<3x16x128xf32, #tpu.memory_space<vmem>>, vector<1x16x128xf32>
    %5 = vector.shape_cast %4 : vector<1x16x128xf32> to vector<16x128xf32>
    %c2 = arith.constant 2 : index
    %c0_8 = arith.constant 0 : index
    %c0_9 = arith.constant 0 : index
    %6 = vector.load %arg3[%c2, %c0_8, %c0_9] : memref<3x16x128xf32, #tpu.memory_space<vmem>>, vector<1x16x128xf32>
    %7 = vector.shape_cast %6 : vector<1x16x128xf32> to vector<16x128xf32>
    %c0_10 = arith.constant 0 : index
    %c0_11 = arith.constant 0 : index
    %8 = vector.load %arg4[%c0_10, %c0_11] : memref<16x18xf32, #tpu.memory_space<vmem>>, vector<16x18xf32>
    %9 = vector.extract_strided_slice %1 {offsets = [0, 0], sizes = [16, 16], strides = [1, 1]} : vector<16x32xf32> to vector<16x16xf32>
    %c0_12 = arith.constant 0 : index
    %c0_13 = arith.constant 0 : index
    %10 = vector.load %arg2[%c0_12, %c0_13] : memref<16x32xf32, #tpu.memory_space<vmem>>, vector<16x32xf32>
    %cst = arith.constant dense<0.000000e+00> : vector<16x32xf32>
    %11 = tpu.matmul %9, %10, %cst {dimension_numbers = #tpu.dot_dimension_numbers<[1], [0], [0], [1], [0, 0, 1, 1], [], []>} : vector<16x16xf32>, vector<16x32xf32>, vector<16x32xf32> -> vector<16x32xf32>
    %12 = tpu.iota {dimensions = array<i32: 0>} : vector<16x32xi32>
    %c8_i32 = arith.constant 8 : i32
    %c0_i32 = arith.constant 0 : i32
    %13 = arith.cmpi eq, %c8_i32, %c0_i32 : i32
    %c1_i32 = arith.constant 1 : i32
    %14 = arith.select %13, %c1_i32, %c8_i32 : i32
    %15 = vector.broadcast %14 : i32 to vector<16x32xi32>
    %16 = arith.remsi %12, %15 : vector<16x32xi32>
    %c0_i32_14 = arith.constant 0 : i32
    %17 = vector.broadcast %c0_i32_14 : i32 to vector<16x32xi32>
    %18 = arith.cmpi ne, %16, %17 : vector<16x32xi32>
    %c0_i32_15 = arith.constant 0 : i32
    %19 = vector.broadcast %c0_i32_15 : i32 to vector<16x32xi32>
    %20 = arith.cmpi slt, %16, %19 : vector<16x32xi32>
    %c0_i32_16 = arith.constant 0 : i32
    %21 = arith.cmpi slt, %14, %c0_i32_16 : i32
    %22 = vector.broadcast %21 : i1 to vector<16x32xi1>
    %23 = vector.broadcast %22 : vector<16x32xi1> to vector<16x32xi1>
    %24 = arith.xori %20, %23 : vector<16x32xi1>
    %25 = arith.andi %24, %18 : vector<16x32xi1>
    %26 = vector.broadcast %14 : i32 to vector<16x32xi32>
    %27 = arith.addi %16, %26 : vector<16x32xi32>
    %28 = arith.select %25, %27, %16 : vector<16x32xi1>, vector<16x32xi32>
    %c7_i32 = arith.constant 7 : i32
    %29 = vector.broadcast %c7_i32 : i32 to vector<16x32xi32>
    %30 = arith.cmpi slt, %28, %29 : vector<16x32xi32>
    %cst_17 = arith.constant 0.707106769 : f32
    %cst_18 = arith.constant 1.000000e+00 : f32
    %31 = vector.broadcast %cst_17 : f32 to vector<16x32xf32>
    %32 = vector.broadcast %cst_18 : f32 to vector<16x32xf32>
    %33 = arith.select %30, %31, %32 : vector<16x32xi1>, vector<16x32xf32>
    %34 = arith.addf %0, %11 : vector<16x32xf32>
    %35 = arith.mulf %34, %33 : vector<16x32xf32>
    %c0_19 = arith.constant 0 : index
    %c0_20 = arith.constant 0 : index
    %c0_21 = arith.constant 0 : index
    %36 = vector.load %arg5[%c0_19, %c0_20, %c0_21] : memref<2x32x768xf32, #tpu.memory_space<vmem>>, vector<1x32x768xf32>
    %37 = vector.shape_cast %36 : vector<1x32x768xf32> to vector<32x768xf32>
    %c0_22 = arith.constant 0 : index
    %c0_23 = arith.constant 0 : index
    %c0_24 = arith.constant 0 : index
    %38 = vector.load %arg6[%c0_22, %c0_23, %c0_24] : memref<2x8x768xf32, #tpu.memory_space<vmem>>, vector<1x8x768xf32>
    %39 = vector.shape_cast %38 : vector<1x8x768xf32> to vector<8x768xf32>
    %c0_25 = arith.constant 0 : index
    %c0_26 = arith.constant 0 : index
    %c0_27 = arith.constant 0 : index
    %40 = vector.load %arg7[%c0_25, %c0_26, %c0_27] : memref<2x128x32xf32, #tpu.memory_space<vmem>>, vector<1x128x32xf32>
    %41 = vector.shape_cast %40 : vector<1x128x32xf32> to vector<128x32xf32>
    %c0_28 = arith.constant 0 : index
    %c0_29 = arith.constant 0 : index
    %c0_30 = arith.constant 0 : index
    %42 = vector.load %arg8[%c0_28, %c0_29, %c0_30] : memref<2x4x64xf32, #tpu.memory_space<vmem>>, vector<1x4x64xf32>
    %43 = vector.shape_cast %42 : vector<1x4x64xf32> to vector<4x64xf32>
    %44 = vector.extract_strided_slice %1 {offsets = [0, 16], sizes = [16, 8], strides = [1, 1]} : vector<16x32xf32> to vector<16x8xf32>
    %cst_31 = arith.constant dense<0.000000e+00> : vector<16xf32>
    %45 = vector.multi_reduction <add>, %35, %cst_31 [1] : vector<16x32xf32> to vector<16xf32>
    %46 = vector.shape_cast %45 : vector<16xf32> to vector<16x1xf32>
    %cst_32 = arith.constant 3.200000e+01 : f32
    %47 = vector.broadcast %cst_32 : f32 to vector<16x1xf32>
    %48 = arith.divf %46, %47 : vector<16x1xf32>
    %49 = vector.broadcast %48 : vector<16x1xf32> to vector<16x32xf32>
    %50 = arith.subf %35, %49 : vector<16x32xf32>
    %51 = arith.mulf %50, %50 : vector<16x32xf32>
    %cst_33 = arith.constant dense<0.000000e+00> : vector<16xf32>
    %52 = vector.multi_reduction <add>, %51, %cst_33 [1] : vector<16x32xf32> to vector<16xf32>
    %53 = vector.shape_cast %52 : vector<16xf32> to vector<16x1xf32>
    %cst_34 = arith.constant 3.200000e+01 : f32
    %54 = vector.broadcast %cst_34 : f32 to vector<16x1xf32>
    %55 = arith.divf %53, %54 : vector<16x1xf32>
    %56 = vector.broadcast %48 : vector<16x1xf32> to vector<16x32xf32>
    %57 = arith.subf %35, %56 : vector<16x32xf32>
    %cst_35 = arith.constant 9.99999974E-6 : f32
    %58 = vector.broadcast %cst_35 : f32 to vector<16x1xf32>
    %59 = arith.addf %55, %58 : vector<16x1xf32>
    %60 = math.rsqrt %59 : vector<16x1xf32>
    %61 = vector.broadcast %60 : vector<16x1xf32> to vector<16x32xf32>
    %62 = arith.mulf %57, %61 : vector<16x32xf32>
    %cst_36 = arith.constant dense<0.000000e+00> : vector<16x768xf32>
    %63 = tpu.matmul %62, %37, %cst_36 {dimension_numbers = #tpu.dot_dimension_numbers<[1], [0], [0], [1], [0, 0, 1, 1], [], []>} : vector<16x32xf32>, vector<32x768xf32>, vector<16x768xf32> -> vector<16x768xf32>
    %64 = vector.extract_strided_slice %63 {offsets = [0, 640], sizes = [16, 8], strides = [1, 1]} : vector<16x768xf32> to vector<16x8xf32>
    %65 = vector.extract_strided_slice %63 {offsets = [0, 648], sizes = [16, 8], strides = [1, 1]} : vector<16x768xf32> to vector<16x8xf32>
    %cst_37 = arith.constant 0.541324854 : f32
    %66 = vector.broadcast %cst_37 : f32 to vector<16x8xf32>
    %67 = arith.addf %65, %66 : vector<16x8xf32>
    %cst_38 = arith.constant 0.000000e+00 : f32
    %68 = vector.broadcast %cst_38 : f32 to vector<16x8xf32>
    %69 = arith.maximumf %67, %68 : vector<16x8xf32>
    %70 = math.absf %67 : vector<16x8xf32>
    %cst_39 = arith.constant 0.000000e+00 : f32
    %71 = vector.broadcast %cst_39 : f32 to vector<16x8xf32>
    %72 = arith.subf %71, %70 : vector<16x8xf32>
    %73 = math.exp %72 : vector<16x8xf32>
    %74 = math.log1p %73 : vector<16x8xf32>
    %75 = arith.addf %69, %74 : vector<16x8xf32>
    %76 = arith.mulf %75, %44 : vector<16x8xf32>
    %77 = arith.addf %64, %76 : vector<16x8xf32>
    %cst_40 = arith.constant dense<0.000000e+00> : vector<16x768xf32>
    %78 = tpu.matmul %77, %39, %cst_40 {dimension_numbers = #tpu.dot_dimension_numbers<[1], [0], [0], [1], [0, 0, 1, 1], [], []>} : vector<16x8xf32>, vector<8x768xf32>, vector<16x768xf32> -> vector<16x768xf32>
    %79 = vector.extract_strided_slice %63 {offsets = [0, 0], sizes = [16, 640], strides = [1, 1]} : vector<16x768xf32> to vector<16x640xf32>
    %80 = vector.extract_strided_slice %78 {offsets = [0, 0], sizes = [16, 640], strides = [1, 1]} : vector<16x768xf32> to vector<16x640xf32>
    %81 = arith.addf %79, %80 : vector<16x640xf32>
    %82 = vector.extract_strided_slice %81 {offsets = [0, 0], sizes = [16, 128], strides = [1, 1]} : vector<16x640xf32> to vector<16x128xf32>
    %83 = arith.mulf %82, %3 : vector<16x128xf32>
    %c4_i32 = arith.constant 4 : i32
    %84 = tpu.dynamic_rotate %82 by %c4_i32 dim 1 : vector<16x128xf32>, i32 -> vector<16x128xf32>
    %85 = arith.mulf %84, %5 : vector<16x128xf32>
    %86 = arith.addf %83, %85 : vector<16x128xf32>
    %c124_i32 = arith.constant 124 : i32
    %87 = tpu.dynamic_rotate %82 by %c124_i32 dim 1 : vector<16x128xf32>, i32 -> vector<16x128xf32>
    %88 = arith.mulf %87, %7 : vector<16x128xf32>
    %89 = arith.addf %86, %88 : vector<16x128xf32>
    %90 = vector.extract_strided_slice %81 {offsets = [0, 128], sizes = [16, 128], strides = [1, 1]} : vector<16x640xf32> to vector<16x128xf32>
    %91 = arith.mulf %90, %3 : vector<16x128xf32>
    %c4_i32_41 = arith.constant 4 : i32
    %92 = tpu.dynamic_rotate %90 by %c4_i32_41 dim 1 : vector<16x128xf32>, i32 -> vector<16x128xf32>
    %93 = arith.mulf %92, %5 : vector<16x128xf32>
    %94 = arith.addf %91, %93 : vector<16x128xf32>
    %c124_i32_42 = arith.constant 124 : i32
    %95 = tpu.dynamic_rotate %90 by %c124_i32_42 dim 1 : vector<16x128xf32>, i32 -> vector<16x128xf32>
    %96 = arith.mulf %95, %7 : vector<16x128xf32>
    %97 = arith.addf %94, %96 : vector<16x128xf32>
    %98 = vector.extract_strided_slice %89 {offsets = [0, 0], sizes = [16, 64], strides = [1, 1]} : vector<16x128xf32> to vector<16x64xf32>
    %99 = vector.extract_strided_slice %97 {offsets = [0, 0], sizes = [16, 64], strides = [1, 1]} : vector<16x128xf32> to vector<16x64xf32>
    %100 = vector.extract_strided_slice %81 {offsets = [0, 256], sizes = [16, 64], strides = [1, 1]} : vector<16x640xf32> to vector<16x64xf32>
    %101 = vector.extract_strided_slice %81 {offsets = [0, 384], sizes = [16, 64], strides = [1, 1]} : vector<16x640xf32> to vector<16x64xf32>
    %102 = vector.extract_strided_slice %81 {offsets = [0, 512], sizes = [16, 64], strides = [1, 1]} : vector<16x640xf32> to vector<16x64xf32>
    %103 = vector.extract_strided_slice %99 {offsets = [0, 0], sizes = [16, 16], strides = [1, 1]} : vector<16x64xf32> to vector<16x16xf32>
    %104 = vector.extract_strided_slice %43 {offsets = [0, 0], sizes = [2, 16], strides = [1, 1]} : vector<4x64xf32> to vector<2x16xf32>
    %105 = tpu.concatenate %103, %104 in 0 : vector<16x16xf32>, vector<2x16xf32> -> vector<18x16xf32>
    %106 = vector.extract_strided_slice %100 {offsets = [0, 0], sizes = [16, 16], strides = [1, 1]} : vector<16x64xf32> to vector<16x16xf32>
    %107 = vector.extract_strided_slice %43 {offsets = [2, 0], sizes = [2, 16], strides = [1, 1]} : vector<4x64xf32> to vector<2x16xf32>
    %108 = tpu.concatenate %106, %107 in 0 : vector<16x16xf32>, vector<2x16xf32> -> vector<18x16xf32>
    %109 = vector.extract_strided_slice %98 {offsets = [0, 0], sizes = [16, 16], strides = [1, 1]} : vector<16x64xf32> to vector<16x16xf32>
    %cst_43 = arith.constant dense<0.000000e+00> : vector<16x18xf32>
    %110 = tpu.matmul %109, %105, %cst_43 {dimension_numbers = #tpu.dot_dimension_numbers<[1], [1], [0], [0], [0, 0, 1, 0], [], []>} : vector<16x16xf32>, vector<18x16xf32>, vector<16x18xf32> -> vector<16x18xf32>
    %111 = arith.addf %110, %8 : vector<16x18xf32>
    %cst_44 = arith.constant dense<0xFF800000> : vector<16xf32>
    %112 = vector.multi_reduction <maximumf>, %111, %cst_44 [1] : vector<16x18xf32> to vector<16xf32>
    %113 = vector.shape_cast %112 : vector<16xf32> to vector<16x1xf32>
    %114 = vector.broadcast %113 : vector<16x1xf32> to vector<16x18xf32>
    %115 = arith.subf %111, %114 : vector<16x18xf32>
    %116 = math.exp %115 : vector<16x18xf32>
    %cst_45 = arith.constant dense<0.000000e+00> : vector<16xf32>
    %117 = vector.multi_reduction <add>, %116, %cst_45 [1] : vector<16x18xf32> to vector<16xf32>
    %118 = vector.shape_cast %117 : vector<16xf32> to vector<16x1xf32>
    %cst_46 = arith.constant dense<0.000000e+00> : vector<16x16xf32>
    %119 = tpu.matmul %116, %108, %cst_46 {dimension_numbers = #tpu.dot_dimension_numbers<[1], [0], [0], [1], [0, 0, 1, 1], [], []>} : vector<16x18xf32>, vector<18x16xf32>, vector<16x16xf32> -> vector<16x16xf32>
    %120 = tpu.reciprocal %118 {approx = true} : vector<16x1xf32> -> vector<16x1xf32>
    %121 = vector.broadcast %120 : vector<16x1xf32> to vector<16x16xf32>
    %122 = arith.mulf %119, %121 : vector<16x16xf32>
    %123 = vector.extract_strided_slice %99 {offsets = [0, 16], sizes = [16, 16], strides = [1, 1]} : vector<16x64xf32> to vector<16x16xf32>
    %124 = vector.extract_strided_slice %43 {offsets = [0, 16], sizes = [2, 16], strides = [1, 1]} : vector<4x64xf32> to vector<2x16xf32>
    %125 = tpu.concatenate %123, %124 in 0 : vector<16x16xf32>, vector<2x16xf32> -> vector<18x16xf32>
    %126 = vector.extract_strided_slice %100 {offsets = [0, 16], sizes = [16, 16], strides = [1, 1]} : vector<16x64xf32> to vector<16x16xf32>
    %127 = vector.extract_strided_slice %43 {offsets = [2, 16], sizes = [2, 16], strides = [1, 1]} : vector<4x64xf32> to vector<2x16xf32>
    %128 = tpu.concatenate %126, %127 in 0 : vector<16x16xf32>, vector<2x16xf32> -> vector<18x16xf32>
    %129 = vector.extract_strided_slice %98 {offsets = [0, 16], sizes = [16, 16], strides = [1, 1]} : vector<16x64xf32> to vector<16x16xf32>
    %cst_47 = arith.constant dense<0.000000e+00> : vector<16x18xf32>
    %130 = tpu.matmul %129, %125, %cst_47 {dimension_numbers = #tpu.dot_dimension_numbers<[1], [1], [0], [0], [0, 0, 1, 0], [], []>} : vector<16x16xf32>, vector<18x16xf32>, vector<16x18xf32> -> vector<16x18xf32>
    %131 = arith.addf %130, %8 : vector<16x18xf32>
    %cst_48 = arith.constant dense<0xFF800000> : vector<16xf32>
    %132 = vector.multi_reduction <maximumf>, %131, %cst_48 [1] : vector<16x18xf32> to vector<16xf32>
    %133 = vector.shape_cast %132 : vector<16xf32> to vector<16x1xf32>
    %134 = vector.broadcast %133 : vector<16x1xf32> to vector<16x18xf32>
    %135 = arith.subf %131, %134 : vector<16x18xf32>
    %136 = math.exp %135 : vector<16x18xf32>
    %cst_49 = arith.constant dense<0.000000e+00> : vector<16xf32>
    %137 = vector.multi_reduction <add>, %136, %cst_49 [1] : vector<16x18xf32> to vector<16xf32>
    %138 = vector.shape_cast %137 : vector<16xf32> to vector<16x1xf32>
    %cst_50 = arith.constant dense<0.000000e+00> : vector<16x16xf32>
    %139 = tpu.matmul %136, %128, %cst_50 {dimension_numbers = #tpu.dot_dimension_numbers<[1], [0], [0], [1], [0, 0, 1, 1], [], []>} : vector<16x18xf32>, vector<18x16xf32>, vector<16x16xf32> -> vector<16x16xf32>
    %140 = tpu.reciprocal %138 {approx = true} : vector<16x1xf32> -> vector<16x1xf32>
    %141 = vector.broadcast %140 : vector<16x1xf32> to vector<16x16xf32>
    %142 = arith.mulf %139, %141 : vector<16x16xf32>
    %143 = vector.extract_strided_slice %99 {offsets = [0, 32], sizes = [16, 16], strides = [1, 1]} : vector<16x64xf32> to vector<16x16xf32>
    %144 = vector.extract_strided_slice %43 {offsets = [0, 32], sizes = [2, 16], strides = [1, 1]} : vector<4x64xf32> to vector<2x16xf32>
    %145 = tpu.concatenate %143, %144 in 0 : vector<16x16xf32>, vector<2x16xf32> -> vector<18x16xf32>
    %146 = vector.extract_strided_slice %100 {offsets = [0, 32], sizes = [16, 16], strides = [1, 1]} : vector<16x64xf32> to vector<16x16xf32>
    %147 = vector.extract_strided_slice %43 {offsets = [2, 32], sizes = [2, 16], strides = [1, 1]} : vector<4x64xf32> to vector<2x16xf32>
    %148 = tpu.concatenate %146, %147 in 0 : vector<16x16xf32>, vector<2x16xf32> -> vector<18x16xf32>
    %149 = vector.extract_strided_slice %98 {offsets = [0, 32], sizes = [16, 16], strides = [1, 1]} : vector<16x64xf32> to vector<16x16xf32>
    %cst_51 = arith.constant dense<0.000000e+00> : vector<16x18xf32>
    %150 = tpu.matmul %149, %145, %cst_51 {dimension_numbers = #tpu.dot_dimension_numbers<[1], [1], [0], [0], [0, 0, 1, 0], [], []>} : vector<16x16xf32>, vector<18x16xf32>, vector<16x18xf32> -> vector<16x18xf32>
    %151 = arith.addf %150, %8 : vector<16x18xf32>
    %cst_52 = arith.constant dense<0xFF800000> : vector<16xf32>
    %152 = vector.multi_reduction <maximumf>, %151, %cst_52 [1] : vector<16x18xf32> to vector<16xf32>
    %153 = vector.shape_cast %152 : vector<16xf32> to vector<16x1xf32>
    %154 = vector.broadcast %153 : vector<16x1xf32> to vector<16x18xf32>
    %155 = arith.subf %151, %154 : vector<16x18xf32>
    %156 = math.exp %155 : vector<16x18xf32>
    %cst_53 = arith.constant dense<0.000000e+00> : vector<16xf32>
    %157 = vector.multi_reduction <add>, %156, %cst_53 [1] : vector<16x18xf32> to vector<16xf32>
    %158 = vector.shape_cast %157 : vector<16xf32> to vector<16x1xf32>
    %cst_54 = arith.constant dense<0.000000e+00> : vector<16x16xf32>
    %159 = tpu.matmul %156, %148, %cst_54 {dimension_numbers = #tpu.dot_dimension_numbers<[1], [0], [0], [1], [0, 0, 1, 1], [], []>} : vector<16x18xf32>, vector<18x16xf32>, vector<16x16xf32> -> vector<16x16xf32>
    %160 = tpu.reciprocal %158 {approx = true} : vector<16x1xf32> -> vector<16x1xf32>
    %161 = vector.broadcast %160 : vector<16x1xf32> to vector<16x16xf32>
    %162 = arith.mulf %159, %161 : vector<16x16xf32>
    %163 = vector.extract_strided_slice %99 {offsets = [0, 48], sizes = [16, 16], strides = [1, 1]} : vector<16x64xf32> to vector<16x16xf32>
    %164 = vector.extract_strided_slice %43 {offsets = [0, 48], sizes = [2, 16], strides = [1, 1]} : vector<4x64xf32> to vector<2x16xf32>
    %165 = tpu.concatenate %163, %164 in 0 : vector<16x16xf32>, vector<2x16xf32> -> vector<18x16xf32>
    %166 = vector.extract_strided_slice %100 {offsets = [0, 48], sizes = [16, 16], strides = [1, 1]} : vector<16x64xf32> to vector<16x16xf32>
    %167 = vector.extract_strided_slice %43 {offsets = [2, 48], sizes = [2, 16], strides = [1, 1]} : vector<4x64xf32> to vector<2x16xf32>
    %168 = tpu.concatenate %166, %167 in 0 : vector<16x16xf32>, vector<2x16xf32> -> vector<18x16xf32>
    %169 = vector.extract_strided_slice %98 {offsets = [0, 48], sizes = [16, 16], strides = [1, 1]} : vector<16x64xf32> to vector<16x16xf32>
    %cst_55 = arith.constant dense<0.000000e+00> : vector<16x18xf32>
    %170 = tpu.matmul %169, %165, %cst_55 {dimension_numbers = #tpu.dot_dimension_numbers<[1], [1], [0], [0], [0, 0, 1, 0], [], []>} : vector<16x16xf32>, vector<18x16xf32>, vector<16x18xf32> -> vector<16x18xf32>
    %171 = arith.addf %170, %8 : vector<16x18xf32>
    %cst_56 = arith.constant dense<0xFF800000> : vector<16xf32>
    %172 = vector.multi_reduction <maximumf>, %171, %cst_56 [1] : vector<16x18xf32> to vector<16xf32>
    %173 = vector.shape_cast %172 : vector<16xf32> to vector<16x1xf32>
    %174 = vector.broadcast %173 : vector<16x1xf32> to vector<16x18xf32>
    %175 = arith.subf %171, %174 : vector<16x18xf32>
    %176 = math.exp %175 : vector<16x18xf32>
    %cst_57 = arith.constant dense<0.000000e+00> : vector<16xf32>
    %177 = vector.multi_reduction <add>, %176, %cst_57 [1] : vector<16x18xf32> to vector<16xf32>
    %178 = vector.shape_cast %177 : vector<16xf32> to vector<16x1xf32>
    %cst_58 = arith.constant dense<0.000000e+00> : vector<16x16xf32>
    %179 = tpu.matmul %176, %168, %cst_58 {dimension_numbers = #tpu.dot_dimension_numbers<[1], [0], [0], [1], [0, 0, 1, 1], [], []>} : vector<16x18xf32>, vector<18x16xf32>, vector<16x16xf32> -> vector<16x16xf32>
    %180 = tpu.reciprocal %178 {approx = true} : vector<16x1xf32> -> vector<16x1xf32>
    %181 = vector.broadcast %180 : vector<16x1xf32> to vector<16x16xf32>
    %182 = arith.mulf %179, %181 : vector<16x16xf32>
    %183 = tpu.concatenate %122, %142, %162, %182 in 1 : vector<16x16xf32>, vector<16x16xf32>, vector<16x16xf32>, vector<16x16xf32> -> vector<16x64xf32>
    %cst_59 = arith.constant 0.000000e+00 : f32
    %184 = vector.broadcast %cst_59 : f32 to vector<16x64xf32>
    %185 = arith.subf %184, %101 : vector<16x64xf32>
    %186 = math.exp %185 : vector<16x64xf32>
    %cst_60 = arith.constant 1.000000e+00 : f32
    %187 = vector.broadcast %cst_60 : f32 to vector<16x64xf32>
    %188 = arith.addf %187, %186 : vector<16x64xf32>
    %189 = tpu.reciprocal %188 {approx = true} : vector<16x64xf32> -> vector<16x64xf32>
    %190 = arith.mulf %101, %189 : vector<16x64xf32>
    %191 = arith.mulf %190, %102 : vector<16x64xf32>
    %192 = tpu.concatenate %183, %191 in 1 : vector<16x64xf32>, vector<16x64xf32> -> vector<16x128xf32>
    %cst_61 = arith.constant dense<0.000000e+00> : vector<16x32xf32>
    %193 = tpu.matmul %192, %41, %cst_61 {dimension_numbers = #tpu.dot_dimension_numbers<[1], [0], [0], [1], [0, 0, 1, 1], [], []>} : vector<16x128xf32>, vector<128x32xf32>, vector<16x32xf32> -> vector<16x32xf32>
    %194 = vector.extract_strided_slice %78 {offsets = [0, 640], sizes = [16, 32], strides = [1, 1]} : vector<16x768xf32> to vector<16x32xf32>
    %195 = arith.addf %193, %194 : vector<16x32xf32>
    %196 = arith.addf %35, %195 : vector<16x32xf32>
    %c1_62 = arith.constant 1 : index
    %c0_63 = arith.constant 0 : index
    %c0_64 = arith.constant 0 : index
    %197 = vector.load %arg5[%c1_62, %c0_63, %c0_64] : memref<2x32x768xf32, #tpu.memory_space<vmem>>, vector<1x32x768xf32>
    %198 = vector.shape_cast %197 : vector<1x32x768xf32> to vector<32x768xf32>
    %199 = vector.extract_strided_slice %1 {offsets = [0, 24], sizes = [16, 8], strides = [1, 1]} : vector<16x32xf32> to vector<16x8xf32>
    %cst_65 = arith.constant dense<0.000000e+00> : vector<16xf32>
    %200 = vector.multi_reduction <add>, %196, %cst_65 [1] : vector<16x32xf32> to vector<16xf32>
    %201 = vector.shape_cast %200 : vector<16xf32> to vector<16x1xf32>
    %cst_66 = arith.constant 3.200000e+01 : f32
    %202 = vector.broadcast %cst_66 : f32 to vector<16x1xf32>
    %203 = arith.divf %201, %202 : vector<16x1xf32>
    %204 = vector.broadcast %203 : vector<16x1xf32> to vector<16x32xf32>
    %205 = arith.subf %196, %204 : vector<16x32xf32>
    %206 = arith.mulf %205, %205 : vector<16x32xf32>
    %cst_67 = arith.constant dense<0.000000e+00> : vector<16xf32>
    %207 = vector.multi_reduction <add>, %206, %cst_67 [1] : vector<16x32xf32> to vector<16xf32>
    %208 = vector.shape_cast %207 : vector<16xf32> to vector<16x1xf32>
    %cst_68 = arith.constant 3.200000e+01 : f32
    %209 = vector.broadcast %cst_68 : f32 to vector<16x1xf32>
    %210 = arith.divf %208, %209 : vector<16x1xf32>
    %211 = vector.broadcast %203 : vector<16x1xf32> to vector<16x32xf32>
    %212 = arith.subf %196, %211 : vector<16x32xf32>
    %cst_69 = arith.constant 9.99999974E-6 : f32
    %213 = vector.broadcast %cst_69 : f32 to vector<16x1xf32>
    %214 = arith.addf %210, %213 : vector<16x1xf32>
    %215 = math.rsqrt %214 : vector<16x1xf32>
    %216 = vector.broadcast %215 : vector<16x1xf32> to vector<16x32xf32>
    %217 = arith.mulf %212, %216 : vector<16x32xf32>
    %cst_70 = arith.constant dense<0.000000e+00> : vector<16x768xf32>
    %218 = tpu.matmul %217, %198, %cst_70 {dimension_numbers = #tpu.dot_dimension_numbers<[1], [0], [0], [1], [0, 0, 1, 1], [], []>} : vector<16x32xf32>, vector<32x768xf32>, vector<16x768xf32> -> vector<16x768xf32>
    %219 = vector.extract_strided_slice %218 {offsets = [0, 640], sizes = [16, 8], strides = [1, 1]} : vector<16x768xf32> to vector<16x8xf32>
    %220 = vector.extract_strided_slice %218 {offsets = [0, 648], sizes = [16, 8], strides = [1, 1]} : vector<16x768xf32> to vector<16x8xf32>
    %cst_71 = arith.constant 0.541324854 : f32
    %221 = vector.broadcast %cst_71 : f32 to vector<16x8xf32>
    %222 = arith.addf %220, %221 : vector<16x8xf32>
    %cst_72 = arith.constant 0.000000e+00 : f32
    %223 = vector.broadcast %cst_72 : f32 to vector<16x8xf32>
    %224 = arith.maximumf %222, %223 : vector<16x8xf32>
    %225 = math.absf %222 : vector<16x8xf32>
    %cst_73 = arith.constant 0.000000e+00 : f32
    %226 = vector.broadcast %cst_73 : f32 to vector<16x8xf32>
    %227 = arith.subf %226, %225 : vector<16x8xf32>
    %228 = math.exp %227 : vector<16x8xf32>
    %229 = math.log1p %228 : vector<16x8xf32>
    %230 = arith.addf %224, %229 : vector<16x8xf32>
    %231 = arith.mulf %230, %199 : vector<16x8xf32>
    %232 = arith.addf %219, %231 : vector<16x8xf32>
    %cst_74 = arith.constant 0.000000e+00 : f32
    %233 = vector.broadcast %cst_74 : f32 to vector<16x80xf32>
    %234 = tpu.concatenate %77, %232, %64, %219, %75, %230, %233 in 1 : vector<16x8xf32>, vector<16x8xf32>, vector<16x8xf32>, vector<16x8xf32>, vector<16x8xf32>, vector<16x8xf32>, vector<16x80xf32> -> vector<16x128xf32>
    %c0_75 = arith.constant 0 : index
    %c0_76 = arith.constant 0 : index
    %235 = vector.load %arg9[%c0_75, %c0_76] : memref<16x128xf32, #tpu.memory_space<vmem>>, vector<16x128xf32>
    tpu.vector_store %arg9[%c0_75, %c0_76], %234 {strides = array<i32>} : memref<16x128xf32, #tpu.memory_space<vmem>>, vector<16x128xf32>,
    return
  }
}

</mosaic_0001>

<bundles_post_ra>
// kernel: tile.52
= control target key start
LH: loop header
LB: loop body
LE: loop exit
PB: predicated region body
PF: predicated region fallthrough
CT: control target
= control target key end

     0   :  { %vm43_vm0 = vcmask 1047556   ;;  %vm45_vm1 = vcmask 130048   ;;  %s94_s22 = smov 16   ;;  %s95_s25 = smov 32   ;;  %vm55_vm2 = vcmask 523648   ;;  %vm65_vm3 = vcmask 392448   ;;  %s147_s0 = inlined_call_operand.vmem [shape: f32[8,4,16], index: 0, kind: input, shape index: {}]   ;;  %s148_s1 = inlined_call_operand.vmem [shape: f32[8,64], index: 1, kind: output, shape index: {}]  }
   0x1   :  { %v83_v0 = vld [vmem:[%s147_s0 + $0x1c] sm:$0xf]  ;;  %v84_v1 = vld [vmem:[%s147_s0 + $0x18] sm:$0xf]  ;;  %v85_v2 = vld [vmem:[%s147_s0 + $0x14] sm:$0xf] }
   0x2   :  { %9 = vst [vmem:[#allocation0 + $0x38] sm:$0xf] %v83_v0  ;;  %14 = vst [vmem:[#allocation0 + $0x30] sm:$0xf] %v84_v1  ;;  %v86_v3 = vld [vmem:[%s147_s0 + $0x10] sm:$0xf] }
   0x3   :  { %19 = vst [vmem:[#allocation0 + $0x28] sm:$0xf] %v85_v2  ;;  %v87_v4 = vld [vmem:[%s147_s0 + $0xc] sm:$0xf]  ;;  %v88_v5 = vld [vmem:[%s147_s0 + $0x8] sm:$0xf] }
   0x4   :  { %24 = vst [vmem:[#allocation0 + $0x20] sm:$0xf] %v86_v3  ;;  %29 = vst [vmem:[#allocation0 + $0x18] sm:$0xf] %v87_v4  ;;  %v89_v6 = vld [vmem:[%s147_s0 + $0x4] sm:$0xf] }
   0x5   :  { %34 = vst [vmem:[#allocation0 + $0x10] sm:$0xf] %v88_v5  ;;  %v39_v7 = vld [vmem:[%s147_s0] sm:$0xf]  ;;  %38 = vst [vmem:[#allocation0 + $0x8] sm:$0xf] %v89_v6 }
   0x6   :  { %40 = vst [vmem:[#allocation0] sm:$0xf] %v39_v7  ;;  %s93_s0 = smov 48   ;;  %vm75_vm4 = vcmask 261248  }
   0xb   :  { %v50_v8 = vld [vmem:[#allocation0 + $0x3] ss:$8 sm:$0xf0]   ;;  %v60_v9 = vld [vmem:[#allocation0 + $0x2] ss:$8 sm:$0xf0]  }
   0xc   :  { %v70_v14 = vld [vmem:[#allocation0 + $0x1] ss:$8 sm:$0xf0]   ;;  %v42_v17 = vld [vmem:[#allocation0] ss:$8 sm:$0xf0]  }
   0xd   :  { %v48_v10 = vld [vmem:[#allocation0 + $0x3] ss:$8 sm:$0xf]   ;;  %v58_v11 = vld [vmem:[#allocation0 + $0x2] ss:$8 sm:$0xf]  }
   0xe   :  { %v52_v12 = vsel %vm43_vm0, %v50_v8, %v48_v10  ;;  %v68_v13 = vld [vmem:[#allocation0 + $0x1] ss:$8 sm:$0xf]   ;;  %v41_v16 = vld [vmem:[#allocation0] ss:$8 sm:$0xf]   ;;  %v62_v18 = vsel %vm43_vm0, %v60_v9, %v58_v11 }
   0xf   :  { %53 = vrot.lane.b32.xlu0 %v52_v12, %s93_s0  ;;  %v72_v15 = vsel %vm43_vm0, %v70_v14, %v68_v13  ;;  %v44_v19 = vsel %vm43_vm0, %v42_v17, %v41_v16 }
  0x10   :  { %73 = vrot.lane.b32.xlu1 %v72_v15, %s94_s22  ;;  %46 = vst.msk [vmem:[%s148_s1] sm:$0xff] %vm45_vm1, %v44_v19  }
  0x13   :  { %63 = vrot.lane.b32.xlu0 %v62_v18, %s95_s25 }
  0x81   :  { %v54_v20 = vpop.permute.xlu0 %53  }
  0x82   :  { %56 = vst.msk [vmem:[%s148_s1] sm:$0xff] %vm55_vm2, %v54_v20   ;;  %v74_v21 = vpop.permute.xlu1 %73  }
  0x85   :  { %v64_v22 = vpop.permute.xlu0 %63  }
  0x86   :  { %66 = vst.msk [vmem:[%s148_s1] sm:$0xff] %vm65_vm3, %v64_v22  }
  0x87   :  { %76 = vst.msk [vmem:[%s148_s1] sm:$0xff] %vm75_vm4, %v74_v21  }

// kernel: zlm_encoder_forward.1
= control target key start
LH: loop header
LB: loop body
LE: loop exit
PB: predicated region body
PF: predicated region fallthrough
CT: control target
= control target key end

     0   :  { %vm48_vm0 = vcmask 130048   ;;  %v130_v4 = vlaneseq  ;;  %v2330_v13 = vmov 1.0   ;;  %vm212_vm3 = vcmask 261120   ;;  %s2332_s30 = smov 120   ;;  %s2334_s15 = smov 4   ;;  %s2943_s2 = inlined_call_operand.vmem [shape: f32[16,32], index: 2, kind: input, shape index: {}]   ;;  %s2944_s1 = inlined_call_operand.vmem [shape: f32[16,32], index: 1, kind: input, shape index: {}]   ;;  %s2945_s0 = inlined_call_operand.vmem [shape: f32[16,32], index: 0, kind: input, shape index: {}]   ;;  %s2946_s5 = inlined_call_operand.vmem [shape: f32[2,32,768], index: 5, kind: input, shape index: {}]   ;;  %s2947_s6 = inlined_call_operand.vmem [shape: f32[2,8,768], index: 6, kind: input, shape index: {}]   ;;  %s2948_s8 = inlined_call_operand.vmem [shape: f32[2,4,64], index: 8, kind: input, shape index: {}]   ;;  %s2949_s3 = inlined_call_operand.vmem [shape: f32[3,16,128], index: 3, kind: input, shape index: {}]   ;;  %s2950_s4 = inlined_call_operand.vmem [shape: f32[16,18], index: 4, kind: input, shape index: {}]   ;;  %s2951_s7 = inlined_call_operand.vmem [shape: f32[2,128,32], index: 7, kind: input, shape index: {}]   ;;  %s2952_s9 = inlined_call_operand.vmem [shape: f32[16,128], index: 9, kind: output, shape index: {}]  }
   0x1   :  { %v47_v0 = vld [vmem:[%s2943_s2 + $0x8] sm:$0xff]  ;;  %v46_v1 = vld [vmem:[%s2943_s2] sm:$0xff]  ;;  %v184_v32 = vld [vmem:[%s2946_s5 + $0x98] sm:$0xff]  ;;  %v2331_v35 = vmov 0.0   ;;  %vm527_vm6 = vcmask 64512   ;;  %vm927_vm7 = vcmask 1041408  }
   0x2   :  { %v2403_v2 = vld [vmem:[%s2944_s1] sm:$0xff]  ;;  %2116 = vmatprep.subr.mxu0 %v47_v0  ;;  %v2410_v3 = vld [vmem:[%s2944_s1 + $0x8] sm:$0xff]  ;;  %v131_v5 = vshrl.u32 %v130_v4, 7  ;;  %v188_v33 = vld [vmem:[%s2946_s5 + $0xb8] sm:$0xff]  ;;  %464 = vmatprep.mubr.f32.mxu1 %v2331_v35  ;;  %vm902_vm8 = vcmask 146432   ;;  %s2335_s29 = smov 112  }
   0x3   :  { %2120 = vmatprep.mubr.msk.f32.mxu0 %vm48_vm0, %v2403_v2  ;;  %2117 = vmatpush3.msra.mxu0 %v47_v0  ;;  %v33_v9 = vld [vmem:[%s2945_s0 + $0x8] sm:$0xff]  ;;  %v32_v11 = vld [vmem:[%s2945_s0] sm:$0xff]  ;;  %v183_v34 = vld [vmem:[%s2946_s5 + $0x90] sm:$0xff]  ;;  %s2337_s10 = smov 80   ;;  %s2338_s11 = smov 16   ;;  %vm1663_vm9 = vcmask 392192  }
   0x4   :  { %2118 = vmatprep.subr.mxu0 %v46_v1  ;;  %v132_v6 = vadd.s32 8, %v131_v5  ;;  %v137_v7 = vand.u32 7, %v131_v5  ;;  %424 = vmatprep.subr.mxu1 %v188_v33  ;;  %v187_v36 = vld [vmem:[%s2946_s5 + $0xb0] sm:$0xff]  ;;  %v178_v37 = vld [vmem:[%s2946_s5 + $0x68] sm:$0xff]  ;;  %v177_v39 = vld [vmem:[%s2946_s5 + $0x60] sm:$0xff]  ;;  %s2339_s12 = smov 32  }
   0x5   :  { %2119 = vmatpush3.msra.mxu0 %v46_v1  ;;  %v182_v38 = vld [vmem:[%s2946_s5 + $0x88] sm:$0xff]  ;;  %425 = vmatpush1.msra.mxu1 %v187_v36  ;;  %v181_v40 = vld [vmem:[%s2946_s5 + $0x80] sm:$0xff]  ;;  %v172_v41 = vld [vmem:[%s2946_s5 + $0x38] sm:$0xff]  ;;  %s2340_s19 = smov 48   ;;  %s2341_s0 = smov 64   ;;  %vm1688_vm10 = vcmask 523264  }
   0x6   :  { %2121 = vmatmul.mubr.msk.f32.vlgmr.msra.gmra.mxu0 %vm48_vm0, %v2410_v3  ;;  %v144_v8 = vand.u32 7, %v132_v6  ;;  %vm157_vm1 = vcmp.lt.s32.totalorder %v137_v7, 7  ;;  %270 = vmatprep.subr.mxu0 %v184_v32  ;;  %v176_v42 = vld [vmem:[%s2946_s5 + $0x58] sm:$0xff]  ;;  %v171_v43 = vld [vmem:[%s2946_s5 + $0x30] sm:$0xff]  ;;  %v166_v45 = vld [vmem:[%s2946_s5 + $0x8] sm:$0xff]  ;;  %vm1978_vm13 = vcmask 195584  }
   0x7   :  { %v159_v14 = vsel %vm157_vm1, 0.70710677, %v2330_v13  ;;  %310 = vmatprep.mubr.f32.mxu0 %v2331_v35  ;;  %271 = vmatpush1.msra.mxu0 %v183_v34  ;;  %v175_v44 = vld [vmem:[%s2946_s5 + $0x50] sm:$0xff]  ;;  %v170_v46 = vld [vmem:[%s2946_s5 + $0x28] sm:$0xff]  ;;  %v165_v47 = vld [vmem:[%s2946_s5] sm:$0xff]  ;;  %vm1983_vm14 = vcmask 326656  }
   0x8   :  { %vm158_vm2 = vcmp.lt.s32.totalorder %v144_v8, 7  ;;  %272 = vmatprep.subr.mxu0 %v178_v37  ;;  %426 = vmatprep.subr.mxu1 %v182_v38  ;;  %v169_v48 = vld [vmem:[%s2946_s5 + $0x20] sm:$0xff]  ;;  %v186_v49 = vld [vmem:[%s2946_s5 + $0xa8] sm:$0xff]  ;;  %v180_v59 = vld [vmem:[%s2946_s5 + $0x78] sm:$0xff] }
   0x9   :  { %v160_v17 = vsel %vm158_vm2, 0.70710677, %v2330_v13  ;;  %273 = vmatpush1.msra.mxu0 %v177_v39  ;;  %427 = vmatpush1.msra.mxu1 %v181_v40  ;;  %v185_v58 = vld [vmem:[%s2946_s5 + $0xa0] sm:$0xff]  ;;  %v179_v60 = vld [vmem:[%s2946_s5 + $0x70] sm:$0xff]  ;;  %v174_v62 = vld [vmem:[%s2946_s5 + $0x48] sm:$0xff] }
   0xa   :  { %274 = vmatprep.subr.mxu0 %v172_v41  ;;  %428 = vmatprep.subr.mxu1 %v176_v42  ;;  %v173_v0 = vld [vmem:[%s2946_s5 + $0x40] sm:$0xff]  ;;  %v168_v1 = vld [vmem:[%s2946_s5 + $0x18] sm:$0xff]  ;;  %v194_v34 = vld [vmem:[%s2947_s6 + $0x28] sm:$0xff] }
   0xb   :  { %275 = vmatpush1.msra.mxu0 %v171_v43  ;;  %429 = vmatpush1.msra.mxu1 %v175_v44  ;;  %v189_v4 = vld [vmem:[%s2947_s6] sm:$0xff] }
   0xc   :  { %276 = vmatprep.subr.mxu0 %v166_v45  ;;  %430 = vmatprep.subr.mxu1 %v170_v46 }
   0xd   :  { %277 = vmatpush1.msra.mxu0 %v165_v47  ;;  %431 = vmatpush1.msra.mxu1 %v169_v48 }
   0xe   :  { %347 = vmatprep.subr.mxu0 %v186_v49 }
  0xc6   :  { %v2122_v10 = vpop.f32.mrf.mxu0 }
  0xc7   :  { %v162_v15 = vadd.f32 %v2122_v10, %v33_v9 }
  0xc8   :  { %v121_v12 = vpop.f32.mrf.mxu0 }
  0xc9   :  { %v161_v16 = vadd.f32 %v121_v12, %v32_v11  ;;  %v2422_v19 = vmul.f32 %v162_v15, %v160_v17 }
  0xcb   :  { %v2420_v18 = vmul.f32 %v161_v16, %v159_v14  ;;  %v216_v21 = vsel %vm212_vm3, %v2422_v19, 0.0 }
  0xcd   :  { %v213_v20 = vsel %vm212_vm3, %v2420_v18, 0.0 }
  0xce   :  { %214 = vadd.xlane.f32.xlu0 %v213_v20 }
  0xd2   :  { %217 = vadd.xlane.f32.xlu0 %v216_v21 }
  0xe8   :  { %509 = vrot.lane.b32.xlu0 %v2403_v2, %s2332_s30  ;;  %v167_v2 = vld [vmem:[%s2946_s5 + $0x10] sm:$0xff] }
 0x157   :  { %v215_v22 = vpop.xlane.xlu0 %214 }
 0x158   :  { %v220_v23 = vmul.f32 0.03125, %v215_v22 }
 0x15a   :  { %v222_v24 = vsub.f32 %v2420_v18, %v220_v23 }
 0x15b   :  { %v218_v25 = vpop.xlane.xlu0 %217 }
 0x15c   :  { %v221_v26 = vmul.f32 0.03125, %v218_v25  ;;  %v224_v27 = vmul.f32 %v222_v24, %v222_v24  ;;  %v191_v25 = vld [vmem:[%s2947_s6 + $0x10] sm:$0xff] }
 0x15e   :  { %v2430_v28 = vsub.f32 %v2422_v19, %v221_v26  ;;  %v226_v29 = vsel %vm212_vm3, %v224_v27, 0.0 }
 0x15f   :  { %227 = vadd.xlane.f32.xlu1 %v226_v29  ;;  %v510_v37 = vpop.permute.xlu0 %509 }
 0x160   :  { %v225_v30 = vmul.f32 %v2430_v28, %v2430_v28 }
 0x162   :  { %v229_v31 = vsel %vm212_vm3, %v225_v30, 0.0 }
 0x163   :  { %230 = vadd.xlane.f32.xlu1 %v229_v31 }
 0x174   :  { %511 = vrot.lane.b32.xlu1 %v2410_v3, %s2332_s30  ;;  %v190_v3 = vld [vmem:[%s2947_s6 + $0x8] sm:$0xff] }
 0x1e8   :  { %v228_v50 = vpop.xlane.xlu1 %227 }
 0x1e9   :  { %v232_v51 = vmul.f32 0.03125, %v228_v50 }
 0x1eb   :  { %v234_v52 = vadd.f32 1e-05, %v232_v51  ;;  %v193_v51 = vld [vmem:[%s2947_s6 + $0x20] sm:$0xff] }
 0x1ec   :  { %v231_v53 = vpop.xlane.xlu1 %230 }
 0x1ed   :  { %2264 = vrsqrt.f32 %v234_v52  ;;  %v233_v54 = vmul.f32 0.03125, %v231_v53 }
 0x1ef   :  { %v235_v55 = vadd.f32 1e-05, %v233_v54  ;;  %v2588_v54 = vld [vmem:[%s2948_s8] sm:$0xf]  ;;  %s2333_s8 = smov 124  }
 0x1f0   :  { %v512_v46 = vpop.permute.xlu1 %511 }
 0x1f1   :  { %2266 = vrsqrt.f32 %v235_v55  ;;  %v2591_v55 = vrot.slane %v2588_v54, 2 }
 0x1fa   :  { %v2265_v56 = vpop.eup %2264 }
 0x1fb   :  { %v238_v57 = vmul.f32 %v2265_v56, %v222_v24  ;;  %v192_v24 = vld [vmem:[%s2947_s6 + $0x18] sm:$0xff] }
 0x1fc   :  { %641 = vmatprep.subr.mxu1 %v192_v24 }
 0x1fd   :  { %2000 = vmatmul.mubr.msk.f32.vlgmr.msra.gmra.mxu0 %vm212_vm3, %v238_v57  ;;  %2004 = vmatmul.mubr.msk.f32.vlgmr.msra.gmra.mxu1 %vm212_vm3, %v238_v57 }
 0x1fe   :  { %v2267_v61 = vpop.eup %2266  ;;  %348 = vmatpush1.msra.mxu0 %v185_v58  ;;  %316 = vmatprep.mubr.f32.mxu0 %v2331_v35 }
 0x1ff   :  { %349 = vmatprep.subr.mxu0 %v180_v59  ;;  %470 = vmatprep.mubr.f32.mxu1 %v2331_v35  ;;  %v239_v63 = vmul.f32 %v2267_v61, %v2430_v28 }
 0x200   :  { %350 = vmatpush1.msra.mxu0 %v179_v60  ;;  %642 = vmatpush1.msra.mxu1 %v191_v25 }
 0x201   :  { %2001 = vmatmul.mubr.msk.f32.gmra.mxu0 %vm212_vm3, %v239_v63  ;;  %351 = vmatprep.subr.mxu0 %v174_v62 }
 0x202   :  { %2005 = vmatmul.mubr.msk.f32.gmra.mxu1 %vm212_vm3, %v239_v63  ;;  %352 = vmatpush1.msra.mxu0 %v173_v0 }
 0x203   :  { %353 = vmatprep.subr.mxu0 %v168_v1  ;;  %387 = vmatprep.mubr.f32.mxu0 %v2331_v35 }
 0x204   :  { %354 = vmatpush1.msra.mxu0 %v167_v2  ;;  %675 = vmatprep.mubr.f32.mxu1 %v2331_v35 }
 0x205   :  { %2002 = vmatmul.mubr.msk.f32.vlgmr.msra.gmra.mxu0 %vm212_vm3, %v238_v57  ;;  %564 = vmatprep.subr.mxu0 %v190_v3 }
 0x206   :  { %393 = vmatprep.mubr.f32.mxu0 %v2331_v35  ;;  %565 = vmatpush1.msra.mxu0 %v189_v4 }
 0x207   :  { %718 = vmatprep.subr.mxu0 %v194_v34  ;;  %2123 = vmatprep.subr.msk.mxu1 %vm48_vm0, %v2588_v54 }
 0x209   :  { %2003 = vmatmul.mubr.msk.f32.gmra.mxu0 %vm212_vm3, %v239_v63 }
 0x20a   :  { %598 = vmatprep.mubr.f32.mxu0 %v2331_v35 }
 0x2bd   :  { %v2533_v5 = vpop.f32.mrf.mxu1  ;;  %v312_v56 = vpop.f32.mrf.mxu0 }
 0x2bf   :  { %v2535_v6 = vpop.f32.mrf.mxu1  ;;  %v314_v57 = vpop.f32.mrf.mxu0 }
 0x2c0   :  { %v477_v7 = vadd.f32 0.54132485, %v2535_v6 }
 0x2c1   :  { %v318_v58 = vpop.f32.mrf.mxu0 }
 0x2c2   :  { %v481_v8 = vand.u32 2147483647, %v477_v7  ;;  %v2538_v9 = vpop.f32.mrf.mxu1  ;;  %v479_v32 = vmax.f32 %v477_v7, 0.0 }
 0x2c3   :  { %v320_v59 = vpop.f32.mrf.mxu0 }
 0x2c4   :  { %v483_v10 = vsub.f32 0.0, %v481_v8  ;;  %v2540_v11 = vpop.f32.mrf.mxu1 }
 0x2c5   :  { %v478_v12 = vadd.f32 0.54132485, %v2540_v11  ;;  %v389_v60 = vpop.f32.mrf.mxu0 }
 0x2c6   :  { %v485_v13 = vmul.f32 1.442695, %v483_v10 }
 0x2c7   :  { %v482_v14 = vand.u32 2147483647, %v478_v12  ;;  %v480_v44 = vmax.f32 %v478_v12, 0.0  ;;  %v391_v61 = vpop.f32.mrf.mxu0 }
 0x2c8   :  { %2268 = vpow2.f32 %v485_v13 }
 0x2c9   :  { %v484_v15 = vsub.f32 0.0, %v482_v14  ;;  %v395_v62 = vpop.f32.mrf.mxu0 }
 0x2cb   :  { %v487_v16 = vmul.f32 1.442695, %v484_v15  ;;  %v397_v63 = vpop.f32.mrf.mxu0 }
 0x2cd   :  { %2270 = vpow2.f32 %v487_v16 }
 0x2d5   :  { %v2269_v17 = vpop.eup %2268 }
 0x2d6   :  { %v489_v20 = vadd.f32 1.0, %v2269_v17  ;;  %v492_v23 = vmul.f32 -0.5, %v2269_v17  ;;  %v495_v27 = vand.u32 2147483647, %v2269_v17 }
 0x2d8   :  { %2272 = vlog2.f32 %v489_v20  ;;  %v493_v26 = vadd.f32 1.0, %v492_v23  ;;  %vm496_vm4 = vcmp.lt.f32.partialorder %v495_v27, 0.0004427343 }
 0x2da   :  { %v2271_v21 = vpop.eup %2270  ;;  %v494_v31 = vmul.f32 %v2269_v17, %v493_v26 }
 0x2db   :  { %v498_v22 = vadd.f32 1.0, %v2271_v21  ;;  %v501_v28 = vmul.f32 -0.5, %v2271_v21  ;;  %v504_v38 = vand.u32 2147483647, %v2271_v21 }
 0x2dd   :  { %2274 = vlog2.f32 %v498_v22  ;;  %v502_v33 = vadd.f32 1.0, %v501_v28  ;;  %vm505_vm5 = vcmp.lt.f32.partialorder %v504_v38, 0.0004427343 }
 0x2df   :  { %v503_v43 = vmul.f32 %v2271_v21, %v502_v33 }
 0x2e5   :  { %v2273_v29 = vpop.eup %2272 }
 0x2e6   :  { %v491_v30 = vmul.f32 0.6931472, %v2273_v29 }
 0x2e8   :  { %v497_v36 = vsel %vm496_vm4, %v494_v31, %v491_v30 }
 0x2e9   :  { %v2552_v39 = vadd.f32 %v497_v36, %v479_v32 }
 0x2ea   :  { %v2275_v40 = vpop.eup %2274 }
 0x2eb   :  { %v515_v41 = vmul.f32 %v510_v37, %v2552_v39  ;;  %v500_v42 = vmul.f32 0.6931472, %v2275_v40 }
 0x2ed   :  { %519 = vrot.lane.b32.xlu1 %v515_v41, %s2332_s30  ;;  %v506_v45 = vsel %vm505_vm5, %v503_v43, %v500_v42 }
 0x2ee   :  { %v2556_v47 = vadd.f32 %v506_v45, %v480_v44  ;;  %v1995_v45 = vld [vmem:[%s2949_s3 + $0x18] sm:$0xff] }
 0x2f0   :  { %v516_v48 = vmul.f32 %v512_v46, %v2556_v47 }
 0x2f2   :  { %521 = vrot.lane.b32.xlu1 %v516_v48, %s2332_s30 }
 0x35f   :  { %v520_v49 = vpop.permute.xlu1 %519 }
 0x360   :  { %v2561_v50 = vadd.f32 %v520_v49, %v2535_v6 }
 0x362   :  { %2006 = vmatmul.mubr.msk.f32.vlgmr.msra.gmra.mxu0 %vm527_vm6, %v2561_v50  ;;  %2008 = vmatmul.mubr.msk.f32.vlgmr.msra.gmra.mxu1 %vm527_vm6, %v2561_v50 }
 0x363   :  { %604 = vmatprep.mubr.f32.mxu0 %v2331_v35  ;;  %681 = vmatprep.mubr.f32.mxu1 %v2331_v35 }
 0x364   :  { %v522_v52 = vpop.permute.xlu1 %521  ;;  %719 = vmatpush1.msra.mxu0 %v193_v51  ;;  %2124 = vmatpush3.xpose.msk.msra.mxu1 %vm48_vm0, %v2588_v54 }
 0x365   :  { %v2573_v53 = vadd.f32 %v522_v52, %v2540_v11  ;;  %2132 = vmatprep.subr.msk.mxu0 %vm927_vm7, %v2591_v55  ;;  %v1994_v52 = vld [vmem:[%s2949_s3 + $0x10] sm:$0xff] }
 0x367   :  { %2007 = vmatmul.mubr.msk.f32.gmra.mxu0 %vm527_vm6, %v2573_v53  ;;  %2009 = vmatmul.mubr.msk.f32.gmra.mxu1 %vm527_vm6, %v2573_v53 }
 0x368   :  { %752 = vmatprep.mubr.f32.mxu0 %v2331_v35 }
 0x36b   :  { %2010 = vmatmul.mubr.msk.f32.vlgmr.msra.gmra.mxu0 %vm527_vm6, %v2561_v50 }
 0x36c   :  { %758 = vmatprep.mubr.f32.mxu0 %v2331_v35  ;;  %2133 = vmatpush3.msk.msra.mxu0 %vm927_vm7, %v2591_v55 }
 0x36f   :  { %2011 = vmatmul.mubr.msk.f32.gmra.mxu0 %vm527_vm6, %v2573_v53 }
 0x422   :  { %v600_v0 = vpop.f32.mrf.mxu0  ;;  %v677_v1 = vpop.f32.mrf.mxu1 }
 0x423   :  { %v2606_v17 = vadd.f32 %v677_v1, %v389_v60  ;;  %v765_v25 = vadd.f32 %v600_v0, %v312_v56  ;;  %v36_v60 = vld [vmem:[%s2949_s3] sm:$0xff] }
 0x424   :  { %v602_v2 = vpop.f32.mrf.mxu0  ;;  %v679_v3 = vpop.f32.mrf.mxu1 }
 0x425   :  { %v2601_v4 = vadd.f32 %v602_v2, %v314_v57  ;;  %v768_v7 = vadd.f32 %v679_v3, %v391_v61 }
 0x427   :  { %v1666_v8 = vsub.f32 0.0, %v768_v7  ;;  %v606_v10 = vpop.f32.mrf.mxu0  ;;  %v683_v12 = vpop.f32.mrf.mxu1  ;;  %803 = vrot.lane.b32.xlu1 %v2601_v4, %s2333_s8 }
 0x428   :  { %v2604_v13 = vadd.f32 %v683_v12, %v395_v62  ;;  %v770_v23 = vadd.f32 %v606_v10, %v318_v58 }
 0x429   :  { %v1668_v14 = vmul.f32 1.442695, %v1666_v8  ;;  %v608_v15 = vpop.f32.mrf.mxu0  ;;  %v685_v16 = vpop.f32.mrf.mxu1 }
 0x42a   :  { %v771_v20 = vadd.f32 %v608_v15, %v320_v59  ;;  %v773_v21 = vadd.f32 %v685_v16, %v397_v63  ;;  %2134 = vmatprep.subr.mxu0 %v2604_v13  ;;  %v1996_v59 = vld [vmem:[%s2949_s3 + $0x20] sm:$0xff]  ;;  %v793_v63 = vmul.f32 %v2601_v4, %v36_v60 }
 0x42b   :  { %2276 = vpow2.f32 %v1668_v14  ;;  %2135 = vmatpush3.msra.mxu0 %v2604_v13  ;;  %v754_v30 = vpop.f32.mrf.mxu0  ;;  %v775_v14 = vmul.f32 %v765_v25, %v36_v60 }
 0x42c   :  { %v1667_v22 = vsub.f32 0.0, %v773_v21  ;;  %2136 = vmatprep.subr.mxu0 %v2606_v17  ;;  %805 = vrot.lane.b32.xlu1 %v771_v20, %s2333_s8  ;;  %v769_v34 = vadd.f32 %v754_v30, %v2533_v5  ;;  %v37_v5 = vld [vmem:[%s2949_s3 + $0x8] sm:$0xff] }
 0x42d   :  { %797 = vrot.lane.b32.xlu0 %v771_v20, %s2334_s15  ;;  %2137 = vmatpush3.msra.mxu0 %v2606_v17  ;;  %v2613_v31 = vpop.f32.mrf.mxu0  ;;  %v794_v49 = vmul.f32 %v771_v20, %v37_v5 }
 0x42e   :  { %v1670_v24 = vmul.f32 1.442695, %v1667_v22 }
 0x42f   :  { %v760_v37 = vpop.f32.mrf.mxu0 }
 0x430   :  { %2278 = vpow2.f32 %v1670_v24  ;;  %779 = vrot.lane.b32.xlu1 %v770_v23, %s2334_s15  ;;  %v774_v41 = vadd.f32 %v760_v37, %v2538_v9  ;;  %v1997_v9 = vld [vmem:[%s2949_s3 + $0x28] sm:$0xff] }
 0x431   :  { %795 = vrot.lane.b32.xlu0 %v2601_v4, %s2334_s15  ;;  %v776_v4 = vmul.f32 %v770_v23, %v37_v5 }
 0x434   :  { %787 = vrot.lane.b32.xlu1 %v770_v23, %s2333_s8  ;;  %v2665_v23 = vld [vmem:[%s2950_s4 + $0x8] sm:$0xff] }
 0x435   :  { %777 = vrot.lane.b32.xlu0 %v765_v25, %s2334_s15 }
 0x438   :  { %v2277_v26 = vpop.eup %2276 }
 0x439   :  { %v1672_v27 = vadd.f32 1.0, %v2277_v26  ;;  %785 = vrot.lane.b32.xlu0 %v765_v25, %s2333_s8 }
 0x43b   :  { %2280 = vrcp.f32 %v1672_v27  ;;  %v2670_v27 = vld [vmem:[%s2950_s4] sm:$0xff]  ;;  %s2336_s4 = smov 96  }
 0x43d   :  { %v2279_v28 = vpop.eup %2278 }
 0x43e   :  { %v1673_v29 = vadd.f32 1.0, %v2279_v28 }
 0x440   :  { %2282 = vrcp.f32 %v1673_v29 }
 0x448   :  { %v2281_v32 = vpop.eup %2280 }
 0x449   :  { %v1676_v33 = vmul.f32 %v2281_v32, %v768_v7 }
 0x44b   :  { %v2616_v36 = vmul.f32 %v1676_v33, %v769_v34 }
 0x44d   :  { %v2283_v38 = vpop.eup %2282 }
 0x44e   :  { %v1677_v40 = vmul.f32 %v2283_v38, %v773_v21 }
 0x450   :  { %v2619_v42 = vmul.f32 %v1677_v40, %v774_v41 }
 0x452   :  { %v2259_v43 = vpack.i.bf16 %v2619_v42, %v2616_v36 }
 0x499   :  { %v804_v44 = vpop.permute.xlu1 %803 }
 0x49a   :  { %v807_v1 = vmul.f32 %v1996_v59, %v804_v44 }
 0x49e   :  { %v806_v46 = vpop.permute.xlu1 %805 }
 0x49f   :  { %v798_v48 = vpop.permute.xlu0 %797  ;;  %v808_v57 = vmul.f32 %v1997_v9, %v806_v46 }
 0x4a0   :  { %v800_v51 = vmul.f32 %v1995_v45, %v798_v48 }
 0x4a2   :  { %v802_v56 = vadd.f32 %v800_v51, %v794_v49  ;;  %v780_v58 = vpop.permute.xlu1 %779 }
 0x4a3   :  { %v796_v61 = vpop.permute.xlu0 %795  ;;  %v782_v12 = vmul.f32 %v1995_v45, %v780_v58  ;;  %v2710_v58 = vpop.f32.mrf.mxu0 }
 0x4a4   :  { %v2641_v62 = vadd.f32 %v808_v57, %v802_v56  ;;  %v799_v0 = vmul.f32 %v1994_v52, %v796_v61 }
 0x4a5   :  { %v784_v22 = vadd.f32 %v782_v12, %v776_v4 }
 0x4a6   :  { %v801_v2 = vadd.f32 %v799_v0, %v793_v63  ;;  %2125 = vmatprep.subr.msk.mxu1 %vm48_vm0, %v2641_v62  ;;  %v788_v10 = vpop.permute.xlu1 %787 }
 0x4a7   :  { %v778_v3 = vpop.permute.xlu0 %777  ;;  %2126 = vmatpush3.xpose.msk.msra.mxu1 %vm48_vm0, %v2641_v62  ;;  %v790_v15 = vmul.f32 %v1997_v9, %v788_v10 }
 0x4a8   :  { %v2648_v7 = vadd.f32 %v807_v1, %v801_v2  ;;  %v781_v8 = vmul.f32 %v1994_v52, %v778_v3 }
 0x4a9   :  { %v2656_v26 = vadd.f32 %v790_v15, %v784_v22 }
 0x4aa   :  { %2127 = vmatprep.subr.msk.mxu1 %vm48_vm0, %v2648_v7  ;;  %v783_v20 = vadd.f32 %v781_v8, %v775_v14 }
 0x4ab   :  { %v786_v16 = vpop.permute.xlu0 %785  ;;  %2128 = vmatpush3.xpose.msk.msra.mxu1 %vm48_vm0, %v2648_v7 }
 0x4ac   :  { %v789_v21 = vmul.f32 %v1996_v59, %v786_v16 }
 0x4ae   :  { %v2654_v24 = vadd.f32 %v789_v21, %v783_v20 }
 0x4b0   :  { %2129 = vmatprep.mubr.msk.f32.mxu1 %vm48_vm0, %v2654_v24 }
 0x4b1   :  { %2130 = vmatmul.mubr.msk.f32.vlgmr.msra.gmra.mxu1 %vm48_vm0, %v2656_v26 }
 0x571   :  { %v2131_v25 = vpop.f32.mrf.mxu1 }
 0x572   :  { %v899_v28 = vadd.f32 %v2131_v25, %v2665_v23 }
 0x573   :  { %v893_v29 = vpop.f32.mrf.mxu1 }
 0x574   :  { %v894_v30 = vadd.f32 %v893_v29, %v2670_v27  ;;  %v906_v32 = vsel %vm902_vm8, %v899_v28, -inf }
 0x575   :  { %907 = vmax.xlane.f32.xlu1 %v906_v32 }
 0x576   :  { %v903_v33 = vsel %vm902_vm8, %v894_v30, -inf }
 0x577   :  { %904 = vmax.xlane.f32.xlu0 %v903_v33 }
 0x586   :  { %1015 = vrot.lane.b32.xlu1 %v2641_v62, %s2335_s29 }
 0x58a   :  { %1009 = vrot.lane.b32.xlu1 %v2654_v24, %s2335_s29 }
 0x58d   :  { %1017 = vrot.lane.b32.xlu0 %v2588_v54, %s2335_s29 }
 0x58e   :  { %1126 = vrot.lane.b32.xlu1 %v2604_v13, %s2335_s29 }
 0x591   :  { %1013 = vrot.lane.b32.xlu0 %v2648_v7, %s2335_s29 }
 0x592   :  { %1124 = vrot.lane.b32.xlu1 %v2606_v17, %s2335_s29 }
 0x595   :  { %1011 = vrot.lane.b32.xlu0 %v2656_v26, %s2335_s29 }
 0x599   :  { %1128 = vrot.lane.b32.xlu0 %v2591_v55, %s2335_s29 }
 0x5fe   :  { %v908_v34 = vpop.xlane.xlu1 %907 }
 0x5ff   :  { %v910_v37 = vsub.f32 %v899_v28, %v908_v34 }
 0x600   :  { %v905_v38 = vpop.xlane.xlu0 %904 }
 0x601   :  { %v909_v40 = vsub.f32 %v894_v30, %v905_v38  ;;  %v913_v41 = vmul.f32 1.442695, %v910_v37 }
 0x602   :  { %v1016_v45 = vpop.permute.xlu1 %1015 }
 0x603   :  { %v911_v44 = vmul.f32 1.442695, %v909_v40 }
 0x604   :  { %v1018_v46 = vpop.permute.xlu0 %1017 }
 0x605   :  { %2284 = vpow2.f32 %v911_v44  ;;  %2141 = vmatprep.subr.msk.mxu0 %vm48_vm0, %v1018_v46 }
 0x606   :  { %2286 = vpow2.f32 %v913_v41  ;;  %v1010_v48 = vpop.permute.xlu1 %1009 }
 0x608   :  { %v1014_v5 = vpop.permute.xlu0 %1013 }
 0x60a   :  { %v1127_v49 = vpop.permute.xlu1 %1126 }
 0x60c   :  { %v1012_v9 = vpop.permute.xlu0 %1011 }
 0x60e   :  { %v1125_v57 = vpop.permute.xlu1 %1124 }
 0x610   :  { %v1129_v51 = vpop.permute.xlu0 %1128 }
 0x611   :  { %2150 = vmatprep.subr.msk.mxu1 %vm927_vm7, %v1129_v51 }
 0x612   :  { %v2694_v52 = vpop.eup %2284  ;;  %2151 = vmatpush3.msk.msra.mxu1 %vm927_vm7, %v1129_v51 }
 0x613   :  { %v2697_v56 = vpop.eup %2286  ;;  %2138 = vmatprep.mubr.msk.f32.mxu0 %vm902_vm8, %v2694_v52  ;;  %2152 = vmatprep.subr.mxu1 %v1127_v49 }
 0x614   :  { %2139 = vmatmul.mubr.msk.f32.vlgmr.msra.gmra.mxu0 %vm902_vm8, %v2697_v56  ;;  %2153 = vmatpush3.msra.mxu1 %v1127_v49 }
 0x615   :  { %2142 = vmatpush3.xpose.msk.msra.mxu0 %vm48_vm0, %v1018_v46  ;;  %2147 = vmatprep.mubr.msk.f32.mxu0 %vm48_vm0, %v1010_v48 }
 0x616   :  { %2143 = vmatprep.subr.msk.mxu0 %vm48_vm0, %v1016_v45  ;;  %2154 = vmatprep.subr.mxu1 %v1125_v57 }
 0x617   :  { %2155 = vmatpush3.msra.mxu1 %v1125_v57 }
 0x619   :  { %2144 = vmatpush3.xpose.msk.msra.mxu0 %vm48_vm0, %v1016_v45 }
 0x61a   :  { %2145 = vmatprep.subr.msk.mxu0 %vm48_vm0, %v1014_v5 }
 0x61d   :  { %2146 = vmatpush3.xpose.msk.msra.mxu0 %vm48_vm0, %v1014_v5 }
 0x620   :  { %2148 = vmatmul.mubr.msk.f32.vlgmr.msra.gmra.mxu0 %vm48_vm0, %v1012_v9 }
 0x6d4   :  { %v2712_v59 = vpop.f32.mrf.mxu0 }
 0x6d6   :  { %v2714_v60 = vpop.f32.mrf.mxu0 }
 0x6e0   :  { %v2149_v61 = vpop.f32.mrf.mxu0 }
 0x6e1   :  { %v1101_v63 = vadd.f32 %v2149_v61, %v2665_v23 }
 0x6e2   :  { %v1095_v0 = vpop.f32.mrf.mxu0 }
 0x6e3   :  { %v1096_v1 = vadd.f32 %v1095_v0, %v2670_v27  ;;  %v1107_v2 = vsel %vm902_vm8, %v1101_v63, -inf }
 0x6e4   :  { %1108 = vmax.xlane.f32.xlu0 %v1107_v2 }
 0x6e5   :  { %v1104_v3 = vsel %vm902_vm8, %v1096_v1, -inf }
 0x6e6   :  { %1105 = vmax.xlane.f32.xlu1 %v1104_v3 }
 0x6f7   :  { %1225 = vrot.lane.b32.xlu1 %v2641_v62, %s2336_s4 }
 0x6fa   :  { %1227 = vrot.lane.b32.xlu0 %v2588_v54, %s2336_s4 }
 0x6fb   :  { %1219 = vrot.lane.b32.xlu1 %v2654_v24, %s2336_s4 }
 0x6fe   :  { %1223 = vrot.lane.b32.xlu0 %v2648_v7, %s2336_s4 }
 0x6ff   :  { %1334 = vrot.lane.b32.xlu1 %v2604_v13, %s2336_s4 }
 0x702   :  { %1221 = vrot.lane.b32.xlu0 %v2656_v26, %s2336_s4 }
 0x703   :  { %1332 = vrot.lane.b32.xlu1 %v2606_v17, %s2336_s4 }
 0x706   :  { %1336 = vrot.lane.b32.xlu0 %v2591_v55, %s2336_s4 }
 0x76d   :  { %v1109_v8 = vpop.xlane.xlu0 %1108 }
 0x76e   :  { %v1111_v10 = vsub.f32 %v1101_v63, %v1109_v8 }
 0x76f   :  { %v1106_v12 = vpop.xlane.xlu1 %1105 }
 0x770   :  { %v1110_v14 = vsub.f32 %v1096_v1, %v1106_v12  ;;  %v1114_v4 = vmul.f32 1.442695, %v1111_v10 }
 0x771   :  { %v1228_v15 = vpop.permute.xlu0 %1227 }
 0x772   :  { %v1112_v16 = vmul.f32 1.442695, %v1110_v14  ;;  %2159 = vmatprep.subr.msk.mxu1 %vm48_vm0, %v1228_v15 }
 0x773   :  { %v1226_v20 = vpop.permute.xlu1 %1225 }
 0x774   :  { %2288 = vpow2.f32 %v1112_v16 }
 0x775   :  { %2290 = vpow2.f32 %v1114_v4  ;;  %v1224_v21 = vpop.permute.xlu0 %1223 }
 0x777   :  { %v1220_v22 = vpop.permute.xlu1 %1219 }
 0x779   :  { %v1222_v25 = vpop.permute.xlu0 %1221 }
 0x77b   :  { %v1335_v28 = vpop.permute.xlu1 %1334 }
 0x77d   :  { %v1337_v29 = vpop.permute.xlu0 %1336 }
 0x77e   :  { %2168 = vmatprep.subr.msk.mxu0 %vm927_vm7, %v1337_v29 }
 0x77f   :  { %2169 = vmatpush3.msk.msra.mxu0 %vm927_vm7, %v1337_v29  ;;  %v1333_v32 = vpop.permute.xlu1 %1332 }
 0x780   :  { %2170 = vmatprep.subr.mxu0 %v1335_v28 }
 0x781   :  { %v2731_v30 = vpop.eup %2288  ;;  %2171 = vmatpush3.msra.mxu0 %v1335_v28 }
 0x782   :  { %v2733_v33 = vpop.eup %2290  ;;  %2156 = vmatprep.mubr.msk.f32.mxu1 %vm902_vm8, %v2731_v30  ;;  %2172 = vmatprep.subr.mxu0 %v1333_v32  ;;  %v1116_v14 = vsel %vm902_vm8, %v2731_v30, 0.0 }
 0x783   :  { %2157 = vmatmul.mubr.msk.f32.vlgmr.msra.gmra.mxu1 %vm902_vm8, %v2733_v33  ;;  %2173 = vmatpush3.msra.mxu0 %v1333_v32 }
 0x784   :  { %2160 = vmatpush3.xpose.msk.msra.mxu1 %vm48_vm0, %v1228_v15  ;;  %2165 = vmatprep.mubr.msk.f32.mxu1 %vm48_vm0, %v1220_v22 }
 0x785   :  { %2161 = vmatprep.subr.msk.mxu1 %vm48_vm0, %v1226_v20 }
 0x788   :  { %2162 = vmatpush3.xpose.msk.msra.mxu1 %vm48_vm0, %v1226_v20 }
 0x789   :  { %2163 = vmatprep.subr.msk.mxu1 %vm48_vm0, %v1224_v21 }
 0x78c   :  { %2164 = vmatpush3.xpose.msk.msra.mxu1 %vm48_vm0, %v1224_v21 }
 0x78f   :  { %2166 = vmatmul.mubr.msk.f32.vlgmr.msra.gmra.mxu1 %vm48_vm0, %v1222_v25 }
 0x843   :  { %v2746_v34 = vpop.f32.mrf.mxu1 }
 0x845   :  { %v2748_v37 = vpop.f32.mrf.mxu1 }
 0x84f   :  { %v2167_v38 = vpop.f32.mrf.mxu1 }
 0x850   :  { %v1311_v40 = vadd.f32 %v2167_v38, %v2665_v23  ;;  %v918_v38 = vsel %vm902_vm8, %v2697_v56, 0.0 }
 0x851   :  { %v1305_v41 = vpop.f32.mrf.mxu1 }
 0x852   :  { %v1306_v44 = vadd.f32 %v1305_v41, %v2670_v27  ;;  %v1317_v45 = vsel %vm902_vm8, %v1311_v40, -inf }
 0x853   :  { %1318 = vmax.xlane.f32.xlu0 %v1317_v45 }
 0x854   :  { %v1314_v46 = vsel %vm902_vm8, %v1306_v44, -inf }
 0x855   :  { %1315 = vmax.xlane.f32.xlu1 %v1314_v46 }
 0x866   :  { %1433 = vrot.lane.b32.xlu1 %v2641_v62, %s2337_s10 }
 0x869   :  { %1435 = vrot.lane.b32.xlu0 %v2588_v54, %s2337_s10 }
 0x86a   :  { %1427 = vrot.lane.b32.xlu1 %v2654_v24, %s2337_s10 }
 0x86d   :  { %1431 = vrot.lane.b32.xlu0 %v2648_v7, %s2337_s10 }
 0x86e   :  { %1542 = vrot.lane.b32.xlu1 %v2604_v13, %s2337_s10 }
 0x871   :  { %1429 = vrot.lane.b32.xlu0 %v2656_v26, %s2337_s10 }
 0x8dc   :  { %v1319_v5 = vpop.xlane.xlu0 %1318 }
 0x8dd   :  { %v1321_v48 = vsub.f32 %v1311_v40, %v1319_v5  ;;  %v915_v40 = vsel %vm902_vm8, %v2694_v52, 0.0 }
 0x8de   :  { %v1316_v9 = vpop.xlane.xlu1 %1315 }
 0x8df   :  { %v1320_v49 = vsub.f32 %v1306_v44, %v1316_v9  ;;  %v1324_v62 = vmul.f32 1.442695, %v1321_v48 }
 0x8e0   :  { %v1436_v51 = vpop.permute.xlu0 %1435 }
 0x8e1   :  { %v1322_v57 = vmul.f32 1.442695, %v1320_v49  ;;  %2177 = vmatprep.subr.msk.mxu0 %vm48_vm0, %v1436_v51 }
 0x8e2   :  { %v1434_v54 = vpop.permute.xlu1 %1433 }
 0x8e3   :  { %2292 = vpow2.f32 %v1322_v57 }
 0x8e4   :  { %2294 = vpow2.f32 %v1324_v62  ;;  %v1432_v26 = vpop.permute.xlu0 %1431 }
 0x8e6   :  { %v1428_v13 = vpop.permute.xlu1 %1427 }
 0x8e8   :  { %v1430_v61 = vpop.permute.xlu0 %1429 }
 0x8ea   :  { %v1543_v15 = vpop.permute.xlu1 %1542 }
 0x8f0   :  { %v2293_v24 = vpop.eup %2292 }
 0x8f1   :  { %v2295_v7 = vpop.eup %2294  ;;  %2174 = vmatprep.mubr.msk.f32.mxu0 %vm902_vm8, %v2293_v24 }
 0x8f2   :  { %2175 = vmatmul.mubr.msk.f32.vlgmr.msra.gmra.mxu0 %vm902_vm8, %v2295_v7  ;;  %v1329_v4 = vsel %vm902_vm8, %v2295_v7, 0.0  ;;  %v207_v7 = vld [vmem:[%s2951_s7 + $0x60] sm:$0xff] }
 0x8f3   :  { %2178 = vmatpush3.xpose.msk.msra.mxu0 %vm48_vm0, %v1436_v51  ;;  %2183 = vmatprep.mubr.msk.f32.mxu0 %vm48_vm0, %v1428_v13  ;;  %v206_v13 = vld [vmem:[%s2951_s7 + $0x58] sm:$0xff] }
 0x8f4   :  { %2179 = vmatprep.subr.msk.mxu0 %vm48_vm0, %v1434_v54 }
 0x8f7   :  { %2180 = vmatpush3.xpose.msk.msra.mxu0 %vm48_vm0, %v1434_v54 }
 0x8f8   :  { %2181 = vmatprep.subr.msk.mxu0 %vm48_vm0, %v1432_v26 }
 0x8fb   :  { %2182 = vmatpush3.xpose.msk.msra.mxu0 %vm48_vm0, %v1432_v26  ;;  %v205_v26 = vld [vmem:[%s2951_s7 + $0x50] sm:$0xff] }
 0x8fe   :  { %2184 = vmatmul.mubr.msk.f32.vlgmr.msra.gmra.mxu0 %vm48_vm0, %v1430_v61  ;;  %v204_v61 = vld [vmem:[%s2951_s7 + $0x48] sm:$0xff] }
 0x8ff   :  { %1873 = vmatprep.mubr.f32.mxu0 %v2331_v35 }
 0x9b2   :  { %v2777_v63 = vpop.f32.mrf.mxu0 }
 0x9b4   :  { %v2779_v0 = vpop.f32.mrf.mxu0 }
 0x9be   :  { %v2185_v1 = vpop.f32.mrf.mxu0 }
 0x9bf   :  { %v1519_v2 = vadd.f32 %v2185_v1, %v2665_v23  ;;  %v1119_v23 = vsel %vm902_vm8, %v2733_v33, 0.0  ;;  %v201_v1 = vld [vmem:[%s2951_s7 + $0x30] sm:$0xff] }
 0x9c0   :  { %v1513_v3 = vpop.f32.mrf.mxu0 }
 0x9c1   :  { %v1514_v8 = vadd.f32 %v1513_v3, %v2670_v27  ;;  %v1525_v10 = vsel %vm902_vm8, %v1519_v2, -inf  ;;  %v1326_v27 = vsel %vm902_vm8, %v2293_v24, 0.0  ;;  %v208_v24 = vld [vmem:[%s2951_s7 + $0x68] sm:$0xff]  ;;  %v199_v3 = vld [vmem:[%s2951_s7 + $0x20] sm:$0xff] }
 0x9c2   :  { %1526 = vmax.xlane.f32.xlu0 %v1525_v10 }
 0x9c3   :  { %v1522_v12 = vsel %vm902_vm8, %v1514_v8, -inf }
 0x9c4   :  { %1523 = vmax.xlane.f32.xlu1 %v1522_v12  ;;  %v198_v12 = vld [vmem:[%s2951_s7 + $0x18] sm:$0xff] }
 0x9d5   :  { %1540 = vrot.lane.b32.xlu1 %v2606_v17, %s2337_s10 }
 0x9d8   :  { %1544 = vrot.lane.b32.xlu0 %v2591_v55, %s2337_s10 }
 0x9f7   :  { %1117 = vadd.xlane.f32.xlu0 %v1116_v14  ;;  %v197_v14 = vld [vmem:[%s2951_s7 + $0x10] sm:$0xff] }
 0x9f9   :  { %1120 = vadd.xlane.f32.xlu1 %v1119_v23  ;;  %v196_v23 = vld [vmem:[%s2951_s7 + $0x8] sm:$0xff] }
 0x9fb   :  { %1327 = vadd.xlane.f32.xlu0 %v1326_v27  ;;  %v195_v27 = vld [vmem:[%s2951_s7] sm:$0xff] }
 0x9ff   :  { %1330 = vadd.xlane.f32.xlu0 %v1329_v4 }
 0xa4b   :  { %v1527_v16 = vpop.xlane.xlu0 %1526 }
 0xa4c   :  { %v1529_v17 = vsub.f32 %v1519_v2, %v1527_v16  ;;  %v200_v2 = vld [vmem:[%s2951_s7 + $0x28] sm:$0xff] }
 0xa4d   :  { %v1524_v20 = vpop.xlane.xlu1 %1523 }
 0xa4e   :  { %v1532_v21 = vmul.f32 1.442695, %v1529_v17  ;;  %v1528_v55 = vsub.f32 %v1514_v8, %v1524_v20 }
 0xa4f   :  { %v1545_v22 = vpop.permute.xlu0 %1544 }
 0xa50   :  { %2296 = vpow2.f32 %v1532_v21  ;;  %v1530_v25 = vmul.f32 1.442695, %v1528_v55  ;;  %2186 = vmatprep.subr.msk.mxu1 %vm927_vm7, %v1545_v22 }
 0xa51   :  { %2187 = vmatpush3.msk.msra.mxu1 %vm927_vm7, %v1545_v22  ;;  %v1541_v28 = vpop.permute.xlu1 %1540 }
 0xa52   :  { %2298 = vpow2.f32 %v1530_v25  ;;  %2188 = vmatprep.subr.mxu1 %v1543_v15 }
 0xa53   :  { %2189 = vmatpush3.msra.mxu1 %v1543_v15 }
 0xa54   :  { %2190 = vmatprep.subr.mxu1 %v1541_v28 }
 0xa55   :  { %2191 = vmatpush3.msra.mxu1 %v1541_v28 }
 0xa5d   :  { %v2297_v29 = vpop.eup %2296 }
 0xa5e   :  { %v1537_v30 = vsel %vm902_vm8, %v2297_v29, 0.0 }
 0xa5f   :  { %v2299_v32 = vpop.eup %2298  ;;  %1538 = vadd.xlane.f32.xlu1 %v1537_v30 }
 0xa60   :  { %2192 = vmatprep.mubr.msk.f32.mxu1 %vm902_vm8, %v2299_v32  ;;  %v1534_v33 = vsel %vm902_vm8, %v2299_v32, 0.0 }
 0xa61   :  { %1535 = vadd.xlane.f32.xlu0 %v1534_v33  ;;  %2193 = vmatmul.mubr.msk.f32.vlgmr.msra.gmra.mxu1 %vm902_vm8, %v2297_v29 }
 0xa63   :  { %919 = vadd.xlane.f32.xlu1 %v918_v38 }
 0xa65   :  { %916 = vadd.xlane.f32.xlu0 %v915_v40 }
 0xa80   :  { %v1118_v41 = vpop.xlane.xlu0 %1117 }
 0xa81   :  { %2300 = vrcp.f32 %v1118_v41 }
 0xa82   :  { %v1121_v44 = vpop.xlane.xlu1 %1120 }
 0xa83   :  { %2302 = vrcp.f32 %v1121_v44 }
 0xa84   :  { %v1328_v45 = vpop.xlane.xlu0 %1327 }
 0xa85   :  { %2304 = vrcp.f32 %v1328_v45 }
 0xa88   :  { %v1331_v46 = vpop.xlane.xlu0 %1330 }
 0xa89   :  { %2306 = vrcp.f32 %v1331_v46 }
 0xa8e   :  { %v2301_v5 = vpop.eup %2300 }
 0xa8f   :  { %v1217_v9 = vmul.f32 %v2301_v5, %v2748_v37  ;;  %v210_v37 = vld [vmem:[%s2951_s7 + $0x78] sm:$0xff] }
 0xa90   :  { %v2303_v48 = vpop.eup %2302  ;;  %2195 = vmatprep.subr.mxu1 %v210_v37 }
 0xa91   :  { %v1218_v49 = vmul.f32 %v2303_v48, %v2746_v34  ;;  %v209_v34 = vld [vmem:[%s2951_s7 + $0x70] sm:$0xff]  ;;  %2196 = vmatpush3.msra.mxu1 %v210_v37 }
 0xa92   :  { %v2305_v62 = vpop.eup %2304  ;;  %2197 = vmatprep.subr.mxu1 %v209_v34 }
 0xa93   :  { %v2244_v56 = vpack.i.bf16 %v1218_v49, %v1217_v9  ;;  %v1425_v51 = vmul.f32 %v2305_v62, %v2779_v0  ;;  %2198 = vmatpush3.msra.mxu1 %v209_v34  ;;  %v202_v0 = vld [vmem:[%s2951_s7 + $0x38] sm:$0xff] }
 0xa94   :  { %2199 = vmatprep.subr.mxu1 %v208_v24 }
 0xa95   :  { %2245 = vrot.lane.b32.xlu0 %v2244_v56, %s2338_s11  ;;  %2200 = vmatpush3.msra.mxu1 %v208_v24 }
 0xa96   :  { %v2307_v52 = vpop.eup %2306  ;;  %2201 = vmatprep.subr.mxu1 %v207_v7 }
 0xa97   :  { %v1426_v57 = vmul.f32 %v2307_v52, %v2777_v63  ;;  %2202 = vmatpush3.msra.mxu1 %v207_v7  ;;  %v203_v63 = vld [vmem:[%s2951_s7 + $0x40] sm:$0xff] }
 0xa98   :  { %2203 = vmatprep.subr.mxu1 %v206_v13 }
 0xa99   :  { %v2249_v54 = vpack.i.bf16 %v1426_v57, %v1425_v51  ;;  %2204 = vmatpush3.msra.mxu1 %v206_v13 }
 0xa9a   :  { %2205 = vmatprep.subr.mxu1 %v205_v26 }
 0xa9b   :  { %2250 = vrot.lane.b32.xlu1 %v2249_v54, %s2339_s12  ;;  %2206 = vmatpush3.msra.mxu1 %v205_v26 }
 0xa9c   :  { %2207 = vmatprep.subr.mxu1 %v204_v61 }
 0xa9d   :  { %2208 = vmatpush3.msra.mxu1 %v204_v61  ;;  %v2328_v61 = vld [vmem:[%s2944_s1 + $0x8] sm:$0xff] }
 0xa9e   :  { %2209 = vmatprep.subr.mxu1 %v203_v63 }
 0xa9f   :  { %2210 = vmatpush3.msra.mxu1 %v203_v63 }
 0xaa0   :  { %2211 = vmatprep.subr.mxu1 %v202_v0 }
 0xaa1   :  { %2212 = vmatpush3.msra.mxu1 %v202_v0 }
 0xaa2   :  { %2213 = vmatprep.subr.mxu1 %v201_v1 }
 0xaa3   :  { %2214 = vmatpush3.msra.mxu1 %v201_v1 }
 0xaa4   :  { %2215 = vmatprep.subr.mxu1 %v200_v2 }
 0xaa5   :  { %2216 = vmatpush3.msra.mxu1 %v200_v2 }
 0xaa6   :  { %2217 = vmatprep.subr.mxu1 %v199_v3 }
 0xaa7   :  { %2218 = vmatpush3.msra.mxu1 %v199_v3 }
 0xaa8   :  { %2219 = vmatprep.subr.mxu1 %v198_v12 }
 0xaa9   :  { %2220 = vmatpush3.msra.mxu1 %v198_v12  ;;  %v2050_v12 = vld [vmem:[%s2946_s5 + $0x170] sm:$0xff] }
 0xaaa   :  { %2221 = vmatprep.subr.mxu1 %v197_v14 }
 0xaab   :  { %2222 = vmatpush3.msra.mxu1 %v197_v14  ;;  %v2049_v14 = vld [vmem:[%s2946_s5 + $0x148] sm:$0xff] }
 0xaac   :  { %2223 = vmatprep.subr.mxu1 %v196_v23 }
 0xaad   :  { %2224 = vmatpush3.msra.mxu1 %v196_v23  ;;  %v2048_v23 = vld [vmem:[%s2946_s5 + $0x140] sm:$0xff] }
 0xaae   :  { %2225 = vmatprep.subr.mxu1 %v195_v27 }
 0xaaf   :  { %2226 = vmatpush3.msra.mxu1 %v195_v27  ;;  %v2047_v27 = vld [vmem:[%s2946_s5 + $0x118] sm:$0xff] }
 0xae8   :  { %v1539_v8 = vpop.xlane.xlu1 %1538 }
 0xae9   :  { %2308 = vrcp.f32 %v1539_v8 }
 0xaea   :  { %v1536_v10 = vpop.xlane.xlu0 %1535 }
 0xaeb   :  { %2310 = vrcp.f32 %v1536_v10  ;;  %v2051_v10 = vld [vmem:[%s2946_s5 + $0x178] sm:$0xff] }
 0xaec   :  { %v920_v22 = vpop.xlane.xlu1 %919  ;;  %1833 = vmatprep.subr.mxu0 %v2051_v10 }
 0xaed   :  { %2312 = vrcp.f32 %v920_v22  ;;  %1834 = vmatpush1.msra.mxu0 %v2050_v12 }
 0xaee   :  { %v917_v25 = vpop.xlane.xlu0 %916  ;;  %1835 = vmatprep.subr.mxu0 %v2049_v14 }
 0xaef   :  { %2314 = vrcp.f32 %v917_v25  ;;  %1836 = vmatpush1.msra.mxu0 %v2048_v23 }
 0xaf0   :  { %1837 = vmatprep.subr.mxu0 %v2047_v27 }
 0xaf6   :  { %v2309_v15 = vpop.eup %2308 }
 0xaf8   :  { %v2311_v16 = vpop.eup %2310 }
 0xafa   :  { %v2313_v30 = vpop.eup %2312 }
 0xafb   :  { %v1008_v46 = vmul.f32 %v2313_v30, %v2712_v59 }
 0xafc   :  { %v2315_v32 = vpop.eup %2314 }
 0xafd   :  { %v1007_v45 = vmul.f32 %v2315_v32, %v2714_v60 }
 0xb07   :  { %v2246_v29 = vpop.permute.xlu0 %2245 }
 0xb08   :  { %v2248_v33 = vunpack.i.h.bf16 %v2246_v29  ;;  %v2247_v38 = vunpack.i.l.bf16 %v2246_v29 }
 0xb0a   :  { %v1659_v42 = vsel %vm48_vm0, %v1007_v45, %v2247_v38 }
 0xb0d   :  { %v2251_v28 = vpop.permute.xlu1 %2250 }
 0xb0e   :  { %v2253_v41 = vunpack.i.h.bf16 %v2251_v28  ;;  %v2252_v44 = vunpack.i.l.bf16 %v2251_v28 }
 0xb10   :  { %v1661_v62 = vsel %vm212_vm3, %v1659_v42, %v2252_v44 }
 0xb21   :  { %v2194_v4 = vpop.f32.mrf.mxu1 }
 0xb22   :  { %v1634_v20 = vmul.f32 %v2309_v15, %v2194_v4  ;;  %v2046_v4 = vld [vmem:[%s2946_s5 + $0x110] sm:$0xff]  ;;  %v2045_v15 = vld [vmem:[%s2946_s5 + $0xe8] sm:$0xff] }
 0xb23   :  { %v1622_v17 = vpop.f32.mrf.mxu1  ;;  %1838 = vmatpush1.msra.mxu0 %v2046_v4 }
 0xb24   :  { %v1633_v21 = vmul.f32 %v2311_v16, %v1622_v17  ;;  %v2329_v16 = vld [vmem:[%s2944_s1] sm:$0xff]  ;;  %1839 = vmatprep.subr.mxu0 %v2045_v15  ;;  %s2342_s1 = smov 24  }
 0xb25   :  { %v2044_v17 = vld [vmem:[%s2946_s5 + $0xe0] sm:$0xff]  ;;  %s2343_s5 = smov 8  }
 0xb26   :  { %v2254_v55 = vpack.i.bf16 %v1634_v20, %v1633_v21  ;;  %1840 = vmatpush1.msra.mxu0 %v2044_v17 }
 0xb28   :  { %2255 = vrot.lane.b32.xlu1 %v2254_v55, %s2340_s19 }
 0xb2c   :  { %2260 = vrot.lane.b32.xlu1 %v2259_v43, %s2341_s0  ;;  %v1660_v43 = vsel %vm48_vm0, %v1008_v46, %v2248_v33 }
 0xb2d   :  { %v1662_v9 = vsel %vm212_vm3, %v1660_v43, %v2253_v41 }
 0xb9a   :  { %v2256_v40 = vpop.permute.xlu1 %2255 }
 0xb9b   :  { %v2258_v5 = vunpack.i.h.bf16 %v2256_v40  ;;  %v2257_v36 = vunpack.i.l.bf16 %v2256_v40 }
 0xb9d   :  { %v1664_v52 = vsel %vm1663_vm9, %v1661_v62, %v2257_v36  ;;  %v1665_v60 = vsel %vm1663_vm9, %v1662_v9, %v2258_v5 }
 0xb9e   :  { %v2261_v48 = vpop.permute.xlu1 %2260 }
 0xb9f   :  { %v2263_v49 = vunpack.i.h.bf16 %v2261_v48  ;;  %v2262_v56 = vunpack.i.l.bf16 %v2261_v48 }
 0xba1   :  { %v1689_v59 = vsel %vm1688_vm10, %v1664_v52, %v2262_v56  ;;  %v1690_v51 = vsel %vm1688_vm10, %v1665_v60, %v2263_v49 }
 0xba2   :  { %2227 = vmatprep.mubr.f32.mxu1 %v1689_v59 }
 0xba3   :  { %2228 = vmatmul.mubr.f32.vlgmr.msra.gmra.mxu1 %v1690_v51 }
 0xc63   :  { %v2229_v57 = vpop.f32.mrf.mxu1 }
 0xc64   :  { %v1763_v54 = vadd.f32 %v2229_v57, %v2710_v58 }
 0xc65   :  { %v1757_v37 = vpop.f32.mrf.mxu1 }
 0xc66   :  { %v1758_v34 = vadd.f32 %v1757_v37, %v2613_v31  ;;  %v1767_v24 = vadd.f32 %v1763_v54, %v2422_v19 }
 0xc68   :  { %v1780_v7 = vsel %vm212_vm3, %v1767_v24, 0.0  ;;  %v1766_v13 = vadd.f32 %v1758_v34, %v2420_v18 }
 0xc69   :  { %1781 = vadd.xlane.f32.xlu1 %v1780_v7 }
 0xc6a   :  { %v1777_v26 = vsel %vm212_vm3, %v1766_v13, 0.0 }
 0xc6b   :  { %1778 = vadd.xlane.f32.xlu0 %v1777_v26 }
 0xc7a   :  { %1918 = vrot.lane.b32.xlu1 %v2328_v61, %s2335_s29 }
 0xcf2   :  { %v1782_v58 = vpop.xlane.xlu1 %1781 }
 0xcf3   :  { %v1784_v63 = vmul.f32 0.03125, %v1782_v58 }
 0xcf4   :  { %v1779_v0 = vpop.xlane.xlu0 %1778 }
 0xcf5   :  { %v1783_v31 = vmul.f32 0.03125, %v1779_v0  ;;  %v1786_v1 = vsub.f32 %v1767_v24, %v1784_v63 }
 0xcf7   :  { %v1785_v19 = vsub.f32 %v1766_v13, %v1783_v31  ;;  %v1788_v18 = vmul.f32 %v1786_v1, %v1786_v1  ;;  %v1919_v31 = vpop.permute.xlu1 %1918 }
 0xcf9   :  { %v1787_v2 = vmul.f32 %v1785_v19, %v1785_v19  ;;  %v1792_v8 = vsel %vm212_vm3, %v1788_v18, 0.0 }
 0xcfb   :  { %v1789_v3 = vsel %vm212_vm3, %v1787_v2, 0.0 }
 0xcfc   :  { %1790 = vadd.xlane.f32.xlu0 %v1789_v3 }
 0xd00   :  { %1793 = vadd.xlane.f32.xlu0 %v1792_v8 }
 0xd16   :  { %1916 = vrot.lane.b32.xlu0 %v2329_v16, %s2335_s29 }
 0xd1a   :  { %1944 = vrot.lane.b32.xlu0 %v2535_v6, %s2338_s11 }
 0xd85   :  { %v1791_v20 = vpop.xlane.xlu0 %1790 }
 0xd86   :  { %v1795_v21 = vmul.f32 0.03125, %v1791_v20 }
 0xd88   :  { %v1797_v55 = vadd.f32 1e-05, %v1795_v21 }
 0xd89   :  { %v1794_v22 = vpop.xlane.xlu0 %1793 }
 0xd8a   :  { %2316 = vrsqrt.f32 %v1797_v55  ;;  %v1796_v25 = vmul.f32 0.03125, %v1794_v22 }
 0xd8c   :  { %v1798_v28 = vadd.f32 1e-05, %v1796_v25 }
 0xd8d   :  { %v1917_v26 = vpop.permute.xlu0 %1916 }
 0xd8e   :  { %2318 = vrsqrt.f32 %v1798_v28 }
 0xd91   :  { %v1945_v12 = vpop.permute.xlu0 %1944 }
 0xd97   :  { %v2317_v29 = vpop.eup %2316 }
 0xd98   :  { %v1801_v30 = vmul.f32 %v2317_v29, %v1785_v19 }
 0xd9a   :  { %2052 = vmatmul.mubr.msk.f32.vlgmr.msra.gmra.mxu0 %vm212_vm3, %v1801_v30 }
 0xd9b   :  { %v2319_v32 = vpop.eup %2318  ;;  %1878 = vmatprep.mubr.f32.mxu0 %v2331_v35 }
 0xd9c   :  { %v1802_v33 = vmul.f32 %v2319_v32, %v1786_v1 }
 0xd9e   :  { %2053 = vmatmul.mubr.msk.f32.gmra.mxu0 %vm212_vm3, %v1802_v33 }
 0xe5a   :  { %v1875_v38 = vpop.f32.mrf.mxu0 }
 0xe5c   :  { %v1876_v6 = vpop.f32.mrf.mxu0 }
 0xe5d   :  { %v1884_v40 = vadd.f32 0.54132485, %v1876_v6  ;;  %1952 = vrot.lane.b32.xlu0 %v1876_v6, %s2342_s1 }
 0xe5e   :  { %v1880_v41 = vpop.f32.mrf.mxu0 }
 0xe5f   :  { %v1888_v44 = vand.u32 2147483647, %v1884_v40  ;;  %v1886_v37 = vmax.f32 %v1884_v40, 0.0 }
 0xe60   :  { %v1881_v45 = vpop.f32.mrf.mxu0 }
 0xe61   :  { %v1890_v46 = vsub.f32 0.0, %v1888_v44  ;;  %v1885_v5 = vadd.f32 0.54132485, %v1881_v45  ;;  %1960 = vrot.lane.b32.xlu0 %v2552_v39, %s2342_s1 }
 0xe63   :  { %v1892_v36 = vmul.f32 1.442695, %v1890_v46  ;;  %v1889_v42 = vand.u32 2147483647, %v1885_v5  ;;  %v1887_v63 = vmax.f32 %v1885_v5, 0.0 }
 0xe65   :  { %2320 = vpow2.f32 %v1892_v36  ;;  %v1891_v35 = vsub.f32 0.0, %v1889_v42 }
 0xe67   :  { %v1894_v43 = vmul.f32 1.442695, %v1891_v35 }
 0xe69   :  { %2322 = vpow2.f32 %v1894_v43 }
 0xe72   :  { %v2321_v48 = vpop.eup %2320 }
 0xe73   :  { %v1896_v9 = vadd.f32 1.0, %v2321_v48  ;;  %v1899_v62 = vmul.f32 -0.5, %v2321_v48  ;;  %v1902_v59 = vand.u32 2147483647, %v2321_v48 }
 0xe75   :  { %2324 = vlog2.f32 %v1896_v9  ;;  %v1900_v52 = vadd.f32 1.0, %v1899_v62  ;;  %vm1903_vm11 = vcmp.lt.f32.partialorder %v1902_v59, 0.0004427343 }
 0xe76   :  { %v2323_v49 = vpop.eup %2322 }
 0xe77   :  { %v1905_v56 = vadd.f32 1.0, %v2323_v49  ;;  %v1908_v60 = vmul.f32 -0.5, %v2323_v49  ;;  %v1901_v54 = vmul.f32 %v2321_v48, %v1900_v52  ;;  %v1911_v34 = vand.u32 2147483647, %v2323_v49 }
 0xe79   :  { %2326 = vlog2.f32 %v1905_v56  ;;  %v1909_v39 = vadd.f32 1.0, %v1908_v60  ;;  %vm1912_vm12 = vcmp.lt.f32.partialorder %v1911_v34, 0.0004427343 }
 0xe7b   :  { %v1910_v58 = vmul.f32 %v2323_v49, %v1909_v39 }
 0xe82   :  { %v2325_v51 = vpop.eup %2324 }
 0xe83   :  { %v1898_v57 = vmul.f32 0.6931472, %v2325_v51 }
 0xe85   :  { %v1904_v24 = vsel %vm1903_vm11, %v1901_v54, %v1898_v57 }
 0xe86   :  { %v2327_v7 = vpop.eup %2326  ;;  %v1914_v13 = vadd.f32 %v1904_v24, %v1886_v37 }
 0xe87   :  { %v1907_v61 = vmul.f32 0.6931472, %v2327_v7 }
 0xe88   :  { %v1922_v0 = vmul.f32 %v1917_v26, %v1914_v13 }
 0xe89   :  { %v1913_v1 = vsel %vm1912_vm12, %v1910_v58, %v1907_v61 }
 0xe8a   :  { %1926 = vrot.lane.b32.xlu1 %v1922_v0, %s2332_s30  ;;  %v1915_v19 = vadd.f32 %v1913_v1, %v1887_v63 }
 0xe8c   :  { %v1923_v2 = vmul.f32 %v1919_v31, %v1915_v19 }
 0xe8e   :  { %1928 = vrot.lane.b32.xlu1 %v1923_v2, %s2332_s30 }
 0xe92   :  { %1946 = vrot.lane.b32.xlu1 %v2540_v11, %s2338_s11 }
 0xe96   :  { %1954 = vrot.lane.b32.xlu1 %v1881_v45, %s2342_s1 }
 0xe9a   :  { %1962 = vrot.lane.b32.xlu1 %v2556_v47, %s2342_s1 }
 0xecf   :  { %v1953_v23 = vpop.permute.xlu0 %1952 }
 0xed3   :  { %v1961_v27 = vpop.permute.xlu0 %1960 }
 0xefc   :  { %v1927_v3 = vpop.permute.xlu1 %1926 }
 0xefd   :  { %v1932_v18 = vadd.f32 %v1927_v3, %v1876_v6 }
 0xeff   :  { %1936 = vrot.lane.b32.xlu0 %v1932_v18, %s2343_s5 }
 0xf00   :  { %v1929_v8 = vpop.permute.xlu1 %1928 }
 0xf01   :  { %v1933_v10 = vadd.f32 %v1929_v8, %v1881_v45 }
 0xf03   :  { %1968 = vrot.lane.b32.xlu0 %v1914_v13, %s2339_s12  ;;  %1938 = vrot.lane.b32.xlu1 %v1933_v10, %s2343_s5 }
 0xf04   :  { %v1947_v14 = vpop.permute.xlu1 %1946 }
 0xf07   :  { %1970 = vrot.lane.b32.xlu1 %v1915_v19, %s2339_s12 }
 0xf08   :  { %v1955_v11 = vpop.permute.xlu1 %1954 }
 0xf0c   :  { %v1963_v4 = vpop.permute.xlu1 %1962 }
 0xf71   :  { %v1937_v15 = vpop.permute.xlu0 %1936 }
 0xf72   :  { %v1974_v47 = vsel %vm527_vm6, %v2561_v50, %v1937_v15 }
 0xf73   :  { %v1976_v16 = vsel %vm48_vm0, %v1974_v47, %v1945_v12 }
 0xf74   :  { %v1979_v17 = vsel %vm1978_vm13, %v1976_v16, %v1953_v23 }
 0xf75   :  { %v1939_v20 = vpop.permute.xlu1 %1938  ;;  %v1981_v21 = vsel %vm212_vm3, %v1979_v17, %v1961_v27  ;;  %v1969_v55 = vpop.permute.xlu0 %1968 }
 0xf76   :  { %v1975_v22 = vsel %vm527_vm6, %v2573_v53, %v1939_v20  ;;  %v1984_v25 = vsel %vm1983_vm14, %v1981_v21, %v1969_v55 }
 0xf77   :  { %v1977_v28 = vsel %vm48_vm0, %v1975_v22, %v1947_v14  ;;  %v1986_v29 = vsel %vm1663_vm9, %v1984_v25, 0.0 }
 0xf78   :  { %1988 = vst [vmem:[%s2952_s9] sm:$0xff] %v1986_v29  ;;  %v1980_v50 = vsel %vm1978_vm13, %v1977_v28, %v1955_v11 }
 0xf79   :  { %v1982_v30 = vsel %vm212_vm3, %v1980_v50, %v1963_v4  ;;  %v1971_v32 = vpop.permute.xlu1 %1970 }
 0xf7a   :  { %v1985_v33 = vsel %vm1983_vm14, %v1982_v30, %v1971_v32 }
 0xf7b   :  { %v1987_v38 = vsel %vm1663_vm9, %v1985_v33, 0.0 }
 0xf7c   :  { %1989 = vst [vmem:[%s2952_s9 + $0x8] sm:$0xff] %v1987_v38 }

</bundles_post_ra>
